<compile_context>
chip_gen: v6e
topology: v6e:2x2x1
jax: 0.10.0
libtpu: 0.0.40
codegen_flags: <defaults>
</compile_context>

<pallas_src>
import math

import jax
import jax.numpy as jnp
import numpy as np
from jax.experimental import pallas as pl
from jax.experimental.pallas import tpu as pltpu


# ----------------------------- Pallas kernel --------------------------------

def _make_decoder_kernel(num_layers, hidden, hp, in_pad_max):
    """Kernel closed over static layer count / padded sizes."""

    def kernel(tok_ref,      # (B, 1)                     int32  VMEM
               emb_ref,      # (V, Ep)                    f32    VMEM (cols 0-padded)
               h0_ref,       # (L, B, H)                  f32    VMEM
               w_ref,        # (L, in_pad_max+Hp+1, 6*Hp) f32    VMEM
               lin_ref,      # (Hp+1, Vp)                 f32    VMEM
               scores_ref,   # (B, Vp)                    f32    VMEM out
               h1_ref):      # (L, B, H)                  f32    VMEM out
        batch = tok_ref.shape[0]
        vocab = emb_ref.shape[0]

        # --- embedding gather as a one-hot MXU matmul (exact, no DMAs) -------
        col = jax.lax.broadcasted_iota(jnp.int32, (batch, vocab), 1)
        onehot = (col == tok_ref[...]).astype(jnp.float32)          # (B, V)
        x = jnp.dot(onehot, emb_ref[...],
                    preferred_element_type=jnp.float32)             # (B, Ep)

        ones = jnp.ones((batch, 1), jnp.float32)
        zpad_h = (jnp.zeros((batch, hp - hidden), jnp.float32)
                  if hp > hidden else None)

        for l in range(num_layers):
            h = h0_ref[l]                                           # (B, H)
            h_pad = (jnp.concatenate([h, zpad_h], axis=1)
                     if zpad_h is not None else h)                  # (B, Hp)

            pieces = [x]
            if x.shape[1] < in_pad_max:
                pieces.append(
                    jnp.zeros((batch, in_pad_max - x.shape[1]), jnp.float32))
            pieces.extend([h_pad, ones])
            xh = jnp.concatenate(pieces, axis=1)     # (B, in_pad_max + Hp + 1)

            # Single fused MXU push per layer; gate blocks are 128-lane aligned
            # and both bias vectors ride in through the trailing ones column.
            g = jnp.dot(xh, w_ref[l], preferred_element_type=jnp.float32)

            gi_r = g[:, 0 * hp:1 * hp]
            gi_z = g[:, 1 * hp:2 * hp]
            gi_n = g[:, 2 * hp:3 * hp]
            gh_r = g[:, 3 * hp:4 * hp]
            gh_z = g[:, 4 * hp:5 * hp]
            gh_n = g[:, 5 * hp:6 * hp]

            # torch.nn.GRUCell semantics (gate order r, z, n).
            r = jax.nn.sigmoid(gi_r + gh_r)
            z = jax.nn.sigmoid(gi_z + gh_z)
            n = jnp.tanh(gi_n + r * gh_n)
            h_new = (1.0 - z) * n + z * h_pad        # padding lanes stay 0

            h1_ref[l] = h_new[:, :hidden]
            # Inter-layer dropout: config.dropout = 0.0 (eval) -> identity.
            x = h_new

        # compute_score: Linear(H -> V); bias fused via ones column, Vp-wide
        # lane-dense store (wrapper slices back to V).
        x1 = jnp.concatenate([x, ones], axis=1)                     # (B, Hp+1)
        scores_ref[...] = jnp.dot(x1, lin_ref[...],
                                  preferred_element_type=jnp.float32)

    return kernel


# ------------------------------ packing --------------------------------------

def _round_up(x, m):
    return ((x + m - 1) // m) * m


def pack_params(params, *, emb_size, hidden):
    """Pack PyTorch-layout parameters into the kernel's fused, lane-aligned
    operand layout.  Done once, not per decode step."""
    L = len(params["gru"])
    H = hidden
    Hp = _round_up(H, 128)
    Ep = _round_up(emb_size, 128)
    V = params["lin_w"].shape[0]
    Vp = _round_up(V, 128)

    in_sizes = [emb_size] + [H] * (L - 1)
    in_pads = [Ep] + [Hp] * (L - 1)
    in_pad_max = max(in_pads)
    K = in_pad_max + Hp + 1            # [x_pad | h_pad | 1]

    # Embedding table, columns zero-padded to Ep (small; VMEM-resident).
    emb = np.zeros((V, Ep), np.float32)
    emb[:, :emb_size] = np.asarray(params["embedding"], np.float32)

    # Per-layer block-diagonal fused weight:
    #   rows [0:in_l)                      -> W_ih^T into gi gate blocks
    #   rows [in_pad_max:in_pad_max+H)     -> W_hh^T into gh gate blocks
    #   row  K-1                           -> b_ih / b_hh
    # Gate g occupies lanes [g*Hp, g*Hp+H); everything else is zero.
    w_layers = []
    for l, layer in enumerate(params["gru"]):
        in_l = in_sizes[l]
        w_ih_t = np.asarray(layer["w_ih"], np.float32).T   # (in_l, 3H)
        w_hh_t = np.asarray(layer["w_hh"], np.float32).T   # (H, 3H)
        b_ih = np.asarray(layer["b_ih"], np.float32)
        b_hh = np.asarray(layer["b_hh"], np.float32)
        w = np.zeros((K, 6 * Hp), np.float32)
        for g in range(3):
            w[:in_l, g * Hp:g * Hp + H] = w_ih_t[:, g * H:(g + 1) * H]
            w[in_pad_max:in_pad_max + H,
              (3 + g) * Hp:(3 + g) * Hp + H] = w_hh_t[:, g * H:(g + 1) * H]
            w[K - 1, g * Hp:g * Hp + H] = b_ih[g * H:(g + 1) * H]
            w[K - 1, (3 + g) * Hp:(3 + g) * Hp + H] = b_hh[g * H:(g + 1) * H]
        w_layers.append(w)

    # Output projection slab: rows [0:H) = lin_w^T, row Hp = bias; columns
    # padded to Vp for a lane-dense scores store.
    lin = np.zeros((Hp + 1, Vp), np.float32)
    lin[:H, :V] = np.asarray(params["lin_w"], np.float32).T
    lin[Hp, :V] = np.asarray(params["lin_b"], np.float32)

    return {
        "emb_pad": jnp.asarray(emb),                    # (V, Ep)
        "w_all": jnp.asarray(np.stack(w_layers)),       # (L, K, 6*Hp)
        "lin_cat": jnp.asarray(lin),                    # (Hp+1, Vp)
        "num_layers": L, "hidden": H, "hp": Hp, "ep": Ep,
        "in_pad_max": in_pad_max, "vocab": V, "vocab_pad": Vp,
    }


# ------------------------------ JAX wrapper ----------------------------------

def rnn_decoder_forward(packed, token_ids, state):
    """Single decoder step.  Returns (scores, new_state, attn_weights=None)."""
    L = packed["num_layers"]
    H = packed["hidden"]
    Hp = packed["hp"]
    V = packed["vocab"]
    Vp = packed["vocab_pad"]
    in_pad_max = packed["in_pad_max"]
    B = token_ids.shape[0]

    tok2d = token_ids.reshape(B, 1).astype(jnp.int32)

    vmem = pl.BlockSpec(memory_space=pltpu.MemorySpace.VMEM)

    # Scoped-VMEM budget from the actual operand footprint (plus headroom).
    operand_bytes = 4 * int(
        tok2d.size + packed["emb_pad"].size + state.size
        + packed["w_all"].size + packed["lin_cat"].size
        + B * Vp + L * B * H)
    vmem_limit = int(min(128 * 1024 * 1024,
                         max(8 * 1024 * 1024, 2 * operand_bytes)))

    scores_pad, h1 = pl.pallas_call(
        _make_decoder_kernel(L, H, Hp, in_pad_max),
        out_shape=(
            jax.ShapeDtypeStruct((B, Vp), jnp.float32),
            jax.ShapeDtypeStruct((L, B, H), jnp.float32),
        ),
        in_specs=[vmem, vmem, vmem, vmem, vmem],
        out_specs=(vmem, vmem),
        compiler_params=pltpu.CompilerParams(vmem_limit_bytes=vmem_limit),
    )(tok2d, packed["emb_pad"], state, packed["w_all"], packed["lin_cat"])

    attn_weights = None        # config.attention == 'None'
    return scores_pad[:, :V], h1, attn_weights


# ------------------------- deterministic parameters ---------------------------

def init_params(key, *, vocab, emb, hidden, num_layers):
    """PyTorch-layout parameters (w_ih: (3H, IN), gate order r, z, n)."""
    ks = jax.random.split(key, 3 + 4 * num_layers)
    k = 1.0 / math.sqrt(hidden)

    def uni(kk, shape):
        return jax.random.uniform(kk, shape, jnp.float32, minval=-k, maxval=k)

    params = {
        "embedding": jax.random.normal(ks[0], (vocab, emb), jnp.float32) * 0.1,
        "lin_w": uni(ks[1], (vocab, hidden)),
        "lin_b": uni(ks[2], (vocab,)),
        "gru": [],
    }
    for l in range(num_layers):
        in_size = emb if l == 0 else hidden
        base = 3 + 4 * l
        params["gru"].append({
            "w_ih": uni(ks[base + 0], (3 * hidden, in_size)),
            "w_hh": uni(ks[base + 1], (3 * hidden, hidden)),
            "b_ih": uni(ks[base + 2], (3 * hidden,)),
            "b_hh": uni(ks[base + 3], (3 * hidden,)),
        })
    return params


# ------------------------------ pure-JAX reference ----------------------------

def reference_forward(params, token_ids, state):
    H = state.shape[-1]
    hp = jax.lax.Precision.HIGHEST
    x = jnp.take(params["embedding"], token_ids, axis=0)
    h1 = []
    for l, layer in enumerate(params["gru"]):
        h = state[l]
        gi = jnp.dot(x, layer["w_ih"].T, precision=hp) + layer["b_ih"]
        gh = jnp.dot(h, layer["w_hh"].T, precision=hp) + layer["b_hh"]
        r = jax.nn.sigmoid(gi[:, :H] + gh[:, :H])
        z = jax.nn.sigmoid(gi[:, H:2 * H] + gh[:, H:2 * H])
        n = jnp.tanh(gi[:, 2 * H:] + r * gh[:, 2 * H:])
        h_new = (1.0 - z) * n + z * h
        h1.append(h_new)
        x = h_new
    scores = jnp.dot(x, params["lin_w"].T, precision=hp) + params["lin_b"]
    return scores, jnp.stack(h1)


# ----------------------------------- main -------------------------------------

if __name__ == "__main__":
    B, E, H, V, L = 8, 32, 32, 64, 2   # batch, emb_size, hidden, tgt_vocab, layers

    root = jax.random.PRNGKey(0)
    k_param, k_tok, k_state = jax.random.split(root, 3)

    params = init_params(k_param, vocab=V, emb=E, hidden=H, num_layers=L)
    packed = pack_params(params, emb_size=E, hidden=H)          # pack once
    token_ids = jax.random.randint(k_tok, (B,), 0, V, dtype=jnp.int32)
    state = jax.random.normal(k_state, (L, B, H), jnp.float32) * 0.5

    scores, new_state, attn = rnn_decoder_forward(packed, token_ids, state)
    jax.block_until_ready((scores, new_state))

    # All-f32 path (one-hot gather is exact; bias fusion only reorders adds),
    # so 1e-5 holds at these sizes.  For much larger K, loosen or pass an
    # explicit matmul precision.
    ref_scores, ref_state = reference_forward(params, token_ids, state)
    np.testing.assert_allclose(np.asarray(scores), np.asarray(ref_scores),
                               rtol=1e-5, atol=1e-5)
    np.testing.assert_allclose(np.asarray(new_state), np.asarray(ref_state),
                               rtol=1e-5, atol=1e-5)

    print("KERNEL_OK")
</pallas_src>

<mosaic_0001>
module attributes {stable_mosaic.version = 11 : i64} {
  func.func @kernel(%arg0: memref<8x1xi32, #tpu.memory_space<vmem>>, %arg1: memref<64x128xf32, #tpu.memory_space<vmem>>, %arg2: memref<2x8x32xf32, #tpu.memory_space<vmem>>, %arg3: memref<2x257x768xf32, #tpu.memory_space<vmem>>, %arg4: memref<129x128xf32, #tpu.memory_space<vmem>>, %arg5: memref<8x128xf32, #tpu.memory_space<vmem>>, %arg6: memref<2x8x32xf32, #tpu.memory_space<vmem>>) attributes {dimension_semantics = [], scalar_prefetch = 0 : i64, scratch_operands = 0 : i64, tpu.core_type = #tpu.core_type<tc>} {
    %0 = tpu.iota {dimensions = array<i32: 1>} : vector<8x64xi32>
    %c0 = arith.constant 0 : index
    %c0_0 = arith.constant 0 : index
    %1 = vector.load %arg0[%c0, %c0_0] : memref<8x1xi32, #tpu.memory_space<vmem>>, vector<8x1xi32>
    %2 = vector.broadcast %1 : vector<8x1xi32> to vector<8x64xi32>
    %3 = arith.cmpi eq, %0, %2 : vector<8x64xi32>
    %4 = arith.extui %3 : vector<8x64xi1> to vector<8x64xi32>
    %5 = arith.sitofp %4 : vector<8x64xi32> to vector<8x64xf32>
    %c0_1 = arith.constant 0 : index
    %c0_2 = arith.constant 0 : index
    %6 = vector.load %arg1[%c0_1, %c0_2] : memref<64x128xf32, #tpu.memory_space<vmem>>, vector<64x128xf32>
    %cst = arith.constant dense<0.000000e+00> : vector<8x128xf32>
    %7 = tpu.matmul %5, %6, %cst {dimension_numbers = #tpu.dot_dimension_numbers<[1], [0], [0], [1], [0, 0, 1, 1], [], []>} : vector<8x64xf32>, vector<64x128xf32>, vector<8x128xf32> -> vector<8x128xf32>
    %cst_3 = arith.constant 1.000000e+00 : f32
    %8 = vector.broadcast %cst_3 : f32 to vector<8x1xf32>
    %cst_4 = arith.constant 0.000000e+00 : f32
    %9 = vector.broadcast %cst_4 : f32 to vector<8x96xf32>
    %c0_5 = arith.constant 0 : index
    %c0_6 = arith.constant 0 : index
    %c0_7 = arith.constant 0 : index
    %10 = vector.load %arg2[%c0_5, %c0_6, %c0_7] : memref<2x8x32xf32, #tpu.memory_space<vmem>>, vector<1x8x32xf32>
    %11 = vector.shape_cast %10 : vector<1x8x32xf32> to vector<8x32xf32>
    %12 = tpu.concatenate %11, %9 in 1 : vector<8x32xf32>, vector<8x96xf32> -> vector<8x128xf32>
    %13 = tpu.concatenate %7, %12, %8 in 1 : vector<8x128xf32>, vector<8x128xf32>, vector<8x1xf32> -> vector<8x257xf32>
    %c0_8 = arith.constant 0 : index
    %c0_9 = arith.constant 0 : index
    %c0_10 = arith.constant 0 : index
    %14 = vector.load %arg3[%c0_8, %c0_9, %c0_10] : memref<2x257x768xf32, #tpu.memory_space<vmem>>, vector<1x257x768xf32>
    %15 = vector.shape_cast %14 : vector<1x257x768xf32> to vector<257x768xf32>
    %cst_11 = arith.constant dense<0.000000e+00> : vector<8x768xf32>
    %16 = tpu.matmul %13, %15, %cst_11 {dimension_numbers = #tpu.dot_dimension_numbers<[1], [0], [0], [1], [0, 0, 1, 1], [], []>} : vector<8x257xf32>, vector<257x768xf32>, vector<8x768xf32> -> vector<8x768xf32>
    %17 = vector.extract_strided_slice %16 {offsets = [0, 0], sizes = [8, 128], strides = [1, 1]} : vector<8x768xf32> to vector<8x128xf32>
    %18 = vector.extract_strided_slice %16 {offsets = [0, 128], sizes = [8, 128], strides = [1, 1]} : vector<8x768xf32> to vector<8x128xf32>
    %19 = vector.extract_strided_slice %16 {offsets = [0, 256], sizes = [8, 128], strides = [1, 1]} : vector<8x768xf32> to vector<8x128xf32>
    %20 = vector.extract_strided_slice %16 {offsets = [0, 384], sizes = [8, 128], strides = [1, 1]} : vector<8x768xf32> to vector<8x128xf32>
    %21 = vector.extract_strided_slice %16 {offsets = [0, 512], sizes = [8, 128], strides = [1, 1]} : vector<8x768xf32> to vector<8x128xf32>
    %22 = vector.extract_strided_slice %16 {offsets = [0, 640], sizes = [8, 128], strides = [1, 1]} : vector<8x768xf32> to vector<8x128xf32>
    %23 = arith.addf %17, %20 : vector<8x128xf32>
    %24 = arith.negf %23 : vector<8x128xf32>
    %25 = math.exp %24 : vector<8x128xf32>
    %cst_12 = arith.constant 1.000000e+00 : f32
    %26 = vector.broadcast %cst_12 : f32 to vector<8x128xf32>
    %27 = arith.addf %26, %25 : vector<8x128xf32>
    %28 = arith.divf %26, %27 : vector<8x128xf32>
    %29 = arith.addf %18, %21 : vector<8x128xf32>
    %30 = arith.negf %29 : vector<8x128xf32>
    %31 = math.exp %30 : vector<8x128xf32>
    %cst_13 = arith.constant 1.000000e+00 : f32
    %32 = vector.broadcast %cst_13 : f32 to vector<8x128xf32>
    %33 = arith.addf %32, %31 : vector<8x128xf32>
    %34 = arith.divf %32, %33 : vector<8x128xf32>
    %35 = arith.mulf %28, %22 : vector<8x128xf32>
    %36 = arith.addf %19, %35 : vector<8x128xf32>
    %37 = math.tanh %36 : vector<8x128xf32>
    %cst_14 = arith.constant 1.000000e+00 : f32
    %38 = vector.broadcast %cst_14 : f32 to vector<8x128xf32>
    %39 = arith.subf %38, %34 : vector<8x128xf32>
    %40 = arith.mulf %39, %37 : vector<8x128xf32>
    %41 = arith.mulf %34, %12 : vector<8x128xf32>
    %42 = arith.addf %40, %41 : vector<8x128xf32>
    %43 = vector.extract_strided_slice %42 {offsets = [0, 0], sizes = [8, 32], strides = [1, 1]} : vector<8x128xf32> to vector<8x32xf32>
    %c0_15 = arith.constant 0 : index
    %c0_16 = arith.constant 0 : index
    %c0_17 = arith.constant 0 : index
    %44 = vector.load %arg6[%c0_15, %c0_16, %c0_17] : memref<2x8x32xf32, #tpu.memory_space<vmem>>, vector<1x8x32xf32>
    %45 = vector.shape_cast %44 : vector<1x8x32xf32> to vector<8x32xf32>
    %46 = vector.shape_cast %43 : vector<8x32xf32> to vector<1x8x32xf32>
    tpu.vector_store %arg6[%c0_15, %c0_16, %c0_17], %46 {strides = array<i32>} : memref<2x8x32xf32, #tpu.memory_space<vmem>>, vector<1x8x32xf32>,
    %c1 = arith.constant 1 : index
    %c0_18 = arith.constant 0 : index
    %c0_19 = arith.constant 0 : index
    %47 = vector.load %arg2[%c1, %c0_18, %c0_19] : memref<2x8x32xf32, #tpu.memory_space<vmem>>, vector<1x8x32xf32>
    %48 = vector.shape_cast %47 : vector<1x8x32xf32> to vector<8x32xf32>
    %49 = tpu.concatenate %48, %9 in 1 : vector<8x32xf32>, vector<8x96xf32> -> vector<8x128xf32>
    %50 = tpu.concatenate %42, %49, %8 in 1 : vector<8x128xf32>, vector<8x128xf32>, vector<8x1xf32> -> vector<8x257xf32>
    %c1_20 = arith.constant 1 : index
    %c0_21 = arith.constant 0 : index
    %c0_22 = arith.constant 0 : index
    %51 = vector.load %arg3[%c1_20, %c0_21, %c0_22] : memref<2x257x768xf32, #tpu.memory_space<vmem>>, vector<1x257x768xf32>
    %52 = vector.shape_cast %51 : vector<1x257x768xf32> to vector<257x768xf32>
    %cst_23 = arith.constant dense<0.000000e+00> : vector<8x768xf32>
    %53 = tpu.matmul %50, %52, %cst_23 {dimension_numbers = #tpu.dot_dimension_numbers<[1], [0], [0], [1], [0, 0, 1, 1], [], []>} : vector<8x257xf32>, vector<257x768xf32>, vector<8x768xf32> -> vector<8x768xf32>
    %54 = vector.extract_strided_slice %53 {offsets = [0, 0], sizes = [8, 128], strides = [1, 1]} : vector<8x768xf32> to vector<8x128xf32>
    %55 = vector.extract_strided_slice %53 {offsets = [0, 128], sizes = [8, 128], strides = [1, 1]} : vector<8x768xf32> to vector<8x128xf32>
    %56 = vector.extract_strided_slice %53 {offsets = [0, 256], sizes = [8, 128], strides = [1, 1]} : vector<8x768xf32> to vector<8x128xf32>
    %57 = vector.extract_strided_slice %53 {offsets = [0, 384], sizes = [8, 128], strides = [1, 1]} : vector<8x768xf32> to vector<8x128xf32>
    %58 = vector.extract_strided_slice %53 {offsets = [0, 512], sizes = [8, 128], strides = [1, 1]} : vector<8x768xf32> to vector<8x128xf32>
    %59 = vector.extract_strided_slice %53 {offsets = [0, 640], sizes = [8, 128], strides = [1, 1]} : vector<8x768xf32> to vector<8x128xf32>
    %60 = arith.addf %54, %57 : vector<8x128xf32>
    %61 = arith.negf %60 : vector<8x128xf32>
    %62 = math.exp %61 : vector<8x128xf32>
    %cst_24 = arith.constant 1.000000e+00 : f32
    %63 = vector.broadcast %cst_24 : f32 to vector<8x128xf32>
    %64 = arith.addf %63, %62 : vector<8x128xf32>
    %65 = arith.divf %63, %64 : vector<8x128xf32>
    %66 = arith.addf %55, %58 : vector<8x128xf32>
    %67 = arith.negf %66 : vector<8x128xf32>
    %68 = math.exp %67 : vector<8x128xf32>
    %cst_25 = arith.constant 1.000000e+00 : f32
    %69 = vector.broadcast %cst_25 : f32 to vector<8x128xf32>
    %70 = arith.addf %69, %68 : vector<8x128xf32>
    %71 = arith.divf %69, %70 : vector<8x128xf32>
    %72 = arith.mulf %65, %59 : vector<8x128xf32>
    %73 = arith.addf %56, %72 : vector<8x128xf32>
    %74 = math.tanh %73 : vector<8x128xf32>
    %cst_26 = arith.constant 1.000000e+00 : f32
    %75 = vector.broadcast %cst_26 : f32 to vector<8x128xf32>
    %76 = arith.subf %75, %71 : vector<8x128xf32>
    %77 = arith.mulf %76, %74 : vector<8x128xf32>
    %78 = arith.mulf %71, %49 : vector<8x128xf32>
    %79 = arith.addf %77, %78 : vector<8x128xf32>
    %80 = vector.extract_strided_slice %79 {offsets = [0, 0], sizes = [8, 32], strides = [1, 1]} : vector<8x128xf32> to vector<8x32xf32>
    %c1_27 = arith.constant 1 : index
    %c0_28 = arith.constant 0 : index
    %c0_29 = arith.constant 0 : index
    %81 = vector.load %arg6[%c1_27, %c0_28, %c0_29] : memref<2x8x32xf32, #tpu.memory_space<vmem>>, vector<1x8x32xf32>
    %82 = vector.shape_cast %81 : vector<1x8x32xf32> to vector<8x32xf32>
    %83 = vector.shape_cast %80 : vector<8x32xf32> to vector<1x8x32xf32>
    tpu.vector_store %arg6[%c1_27, %c0_28, %c0_29], %83 {strides = array<i32>} : memref<2x8x32xf32, #tpu.memory_space<vmem>>, vector<1x8x32xf32>,
    %84 = tpu.concatenate %79, %8 in 1 : vector<8x128xf32>, vector<8x1xf32> -> vector<8x129xf32>
    %c0_30 = arith.constant 0 : index
    %c0_31 = arith.constant 0 : index
    %85 = vector.load %arg4[%c0_30, %c0_31] : memref<129x128xf32, #tpu.memory_space<vmem>>, vector<129x128xf32>
    %cst_32 = arith.constant dense<0.000000e+00> : vector<8x128xf32>
    %86 = tpu.matmul %84, %85, %cst_32 {dimension_numbers = #tpu.dot_dimension_numbers<[1], [0], [0], [1], [0, 0, 1, 1], [], []>} : vector<8x129xf32>, vector<129x128xf32>, vector<8x128xf32> -> vector<8x128xf32>
    %c0_33 = arith.constant 0 : index
    %c0_34 = arith.constant 0 : index
    %87 = vector.load %arg5[%c0_33, %c0_34] : memref<8x128xf32, #tpu.memory_space<vmem>>, vector<8x128xf32>
    tpu.vector_store %arg5[%c0_33, %c0_34], %86 {strides = array<i32>} : memref<8x128xf32, #tpu.memory_space<vmem>>, vector<8x128xf32>,
    return
  }
}

</mosaic_0001>

<bundles_post_ra>
// kernel: tpu_custom_call.1
= control target key start
LH: loop header
LB: loop body
LE: loop exit
PB: predicated region body
PF: predicated region fallthrough
CT: control target
= control target key end

     0   :  { %12 = vsyncpa [#allocation3], 0  ;;  %v1909_v2 = vmov 0   ;;  %v1910_v3 = vmov 0.0   ;;  %vm1911_vm0 = vmmov 0   ;;  %s3323_s0 = inlined_call_operand.vmem [shape: s32[8,1], index: 0, kind: input, shape index: {}]   ;;  %s3324_s1 = inlined_call_operand.vmem [shape: f32[64,128], index: 1, kind: input, shape index: {}]   ;;  %s3325_s2 = inlined_call_operand.vmem [shape: f32[2,8,32], index: 2, kind: input, shape index: {}]   ;;  %s3326_s3 = inlined_call_operand.vmem [shape: f32[2,257,768], index: 3, kind: input, shape index: {}]   ;;  %s3327_s4 = inlined_call_operand.vmem [shape: f32[129,128], index: 4, kind: input, shape index: {}]   ;;  %s3328_s5 = inlined_call_operand.hbm [shape: f32[8,128], index: 5, kind: output, shape index: {0}]   ;;  %s3329_s6 = inlined_call_operand.hbm [shape: f32[2,8,32], index: 6, kind: output, shape index: {1}]  }
   0x1   :  { %v26_v0 = vld [vmem:[%s3323_s0] sm:$0xff]  ;;  %v40_v1 = vld [vmem:[%s3324_s1 + $0x38] sm:$0xff]  ;;  %1844 = vset.pattern.permute.xlu0 %v1909_v2  ;;  %1817 = vmatprep.subr.mxu0 %v1910_v3  ;;  %v39_v4 = vld [vmem:[%s3324_s1 + $0x30] sm:$0xff] }
   0x2   :  { %28 = vperm.xlu0 %1844, %v26_v0   ;;  %1818 = vmatpush3.msra.mxu0 %v40_v1  ;;  %v38_v5 = vld [vmem:[%s3324_s1 + $0x28] sm:$0xff]  ;;  %v209_v6 = vld [vmem:[%s3326_s3 + $0x2d8] sm:$0xff]  ;;  %v208_v7 = vld [vmem:[%s3326_s3 + $0x2d0] sm:$0xff] }
   0x3   :  { %1819 = vmatprep.subr.mxu0 %v1910_v3  ;;  %1833 = vmatprep.mubr.msk.f32.mxu0 %vm1911_vm0, %v1910_v3  ;;  %v203_v8 = vld [vmem:[%s3326_s3 + $0x2a8] sm:$0xff]  ;;  %v37_v9 = vld [vmem:[%s3324_s1 + $0x20] sm:$0xff]  ;;  %v197_v11 = vld [vmem:[%s3326_s3 + $0x278] sm:$0xff] }
   0x4   :  { %1820 = vmatpush3.msra.mxu0 %v39_v4  ;;  %339 = vmatprep.subr.mxu1 %v209_v6  ;;  %v202_v10 = vld [vmem:[%s3326_s3 + $0x2a0] sm:$0xff] }
   0x5   :  { %1821 = vmatprep.subr.mxu0 %v1910_v3  ;;  %340 = vmatpush1.msra.mxu1 %v208_v7 }
   0x6   :  { %1822 = vmatpush3.msra.mxu0 %v38_v5  ;;  %341 = vmatprep.subr.mxu1 %v203_v8 }
   0x7   :  { %13 = vsyncpa [#allocation5], 0  ;;  %1823 = vmatprep.subr.mxu0 %v1910_v3  ;;  %v36_v12 = vld [vmem:[%s3324_s1 + $0x18] sm:$0xff]  ;;  %342 = vmatpush1.msra.mxu1 %v202_v10  ;;  %v196_v13 = vld [vmem:[%s3326_s3 + $0x270] sm:$0xff]  ;;  %vm320_vm1 = vcmask 1040384   ;;  %vm41_vm2 = vcmask 523264  }
   0x8   :  { %1824 = vmatpush3.msra.mxu0 %v37_v9  ;;  %343 = vmatprep.subr.mxu1 %v197_v11  ;;  %v191_v14 = vld [vmem:[%s3326_s3 + $0x248] sm:$0xff]  ;;  %v35_v15 = vld [vmem:[%s3324_s1 + $0x10] sm:$0xff]  ;;  %v190_v16 = vld [vmem:[%s3326_s3 + $0x240] sm:$0xff]  ;;  %vm316_vm4 = vcmask 7168   ;;  %vm116_vm5 = vcmask 261120  }
   0x9   :  { %1825 = vmatprep.subr.mxu0 %v1910_v3  ;;  %344 = vmatpush1.msra.mxu1 %v196_v13  ;;  %v185_v17 = vld [vmem:[%s3326_s3 + $0x218] sm:$0xff]  ;;  %v34_v18 = vld [vmem:[%s3324_s1 + $0x8] sm:$0xff]  ;;  %v184_v19 = vld [vmem:[%s3326_s3 + $0x210] sm:$0xff]  ;;  %v24_v13 = vlaneseq }
   0xa   :  { %1826 = vmatpush3.msra.mxu0 %v36_v12  ;;  %345 = vmatprep.subr.mxu1 %v191_v14  ;;  %v179_v20 = vld [vmem:[%s3326_s3 + $0x1e8] sm:$0xff]  ;;  %v33_v21 = vld [vmem:[%s3324_s1] sm:$0xff]  ;;  %v173_v24 = vld [vmem:[%s3326_s3 + $0x1b8] sm:$0xff] }
   0xb   :  { %1827 = vmatprep.subr.mxu0 %v1910_v3  ;;  %346 = vmatpush1.msra.mxu1 %v190_v16  ;;  %v178_v22 = vld [vmem:[%s3326_s3 + $0x1e0] sm:$0xff]  ;;  %v311_v23 = vld [vmem:[%s3326_s3 + $0x608] sm:$0x1]  ;;  %v172_v25 = vld [vmem:[%s3326_s3 + $0x1b0] sm:$0xff]  ;;  %v25_v14 = vand.u32 127, %v24_v13 }
   0xc   :  { %1828 = vmatpush3.msra.mxu0 %v35_v15  ;;  %347 = vmatprep.subr.mxu1 %v185_v17  ;;  %v167_v26 = vld [vmem:[%s3326_s3 + $0x188] sm:$0xff]  ;;  %v166_v27 = vld [vmem:[%s3326_s3 + $0x180] sm:$0xff]  ;;  %v161_v28 = vld [vmem:[%s3326_s3 + $0x158] sm:$0xff] }
   0xd   :  { %1829 = vmatprep.subr.mxu0 %v1910_v3  ;;  %348 = vmatpush1.msra.mxu1 %v184_v19  ;;  %v160_v29 = vld [vmem:[%s3326_s3 + $0x150] sm:$0xff]  ;;  %v155_v30 = vld [vmem:[%s3326_s3 + $0x128] sm:$0xff]  ;;  %v154_v31 = vld [vmem:[%s3326_s3 + $0x120] sm:$0xff] }
   0xe   :  { %1830 = vmatpush3.msra.mxu0 %v34_v18  ;;  %349 = vmatprep.subr.mxu1 %v179_v20  ;;  %v149_v32 = vld [vmem:[%s3326_s3 + $0xf8] sm:$0xff]  ;;  %v148_v33 = vld [vmem:[%s3326_s3 + $0xf0] sm:$0xff]  ;;  %v143_v34 = vld [vmem:[%s3326_s3 + $0xc8] sm:$0xff] }
   0xf   :  { %1831 = vmatprep.subr.mxu0 %v1910_v3  ;;  %350 = vmatpush1.msra.mxu1 %v178_v22  ;;  %v142_v35 = vld [vmem:[%s3326_s3 + $0xc0] sm:$0xff]  ;;  %v137_v36 = vld [vmem:[%s3326_s3 + $0x98] sm:$0xff]  ;;  %v136_v37 = vld [vmem:[%s3326_s3 + $0x90] sm:$0xff] }
  0x10   :  { %1832 = vmatpush3.msra.mxu0 %v33_v21  ;;  %351 = vmatprep.subr.mxu1 %v173_v24  ;;  %v131_v38 = vld [vmem:[%s3326_s3 + $0x68] sm:$0xff]  ;;  %v130_v39 = vld [vmem:[%s3326_s3 + $0x60] sm:$0xff]  ;;  %v125_v40 = vld [vmem:[%s3326_s3 + $0x38] sm:$0xff]  ;;  %v1912_v21 = vmov 1.0  }
  0x11   :  { %1580 = vmatprep.subr.msk.mxu0 %vm320_vm1, %v311_v23  ;;  %352 = vmatpush1.msra.mxu1 %v172_v25  ;;  %v124_v41 = vld [vmem:[%s3326_s3 + $0x30] sm:$0xff]  ;;  %v119_v42 = vld [vmem:[%s3326_s3 + $0x8] sm:$0xff]  ;;  %v118_v43 = vld [vmem:[%s3326_s3] sm:$0xff] }
  0x12   :  { %353 = vmatprep.subr.mxu1 %v167_v26  ;;  %v305_v44 = vld [vmem:[%s3326_s3 + $0x5d8] sm:$0xff]  ;;  %v304_v45 = vld [vmem:[%s3326_s3 + $0x5d0] sm:$0xff]  ;;  %v299_v46 = vld [vmem:[%s3326_s3 + $0x5a8] sm:$0xff] }
  0x13   :  { %354 = vmatpush1.msra.mxu1 %v166_v27  ;;  %v298_v47 = vld [vmem:[%s3326_s3 + $0x5a0] sm:$0xff]  ;;  %v293_v48 = vld [vmem:[%s3326_s3 + $0x578] sm:$0xff]  ;;  %v292_v49 = vld [vmem:[%s3326_s3 + $0x570] sm:$0xff] }
  0x14   :  { %355 = vmatprep.subr.mxu1 %v161_v28  ;;  %v287_v50 = vld [vmem:[%s3326_s3 + $0x548] sm:$0xff]  ;;  %v286_v51 = vld [vmem:[%s3326_s3 + $0x540] sm:$0xff]  ;;  %v281_v52 = vld [vmem:[%s3326_s3 + $0x518] sm:$0xff] }
  0x15   :  { %356 = vmatpush1.msra.mxu1 %v160_v29  ;;  %v280_v53 = vld [vmem:[%s3326_s3 + $0x510] sm:$0xff]  ;;  %v275_v54 = vld [vmem:[%s3326_s3 + $0x4e8] sm:$0xff]  ;;  %v274_v55 = vld [vmem:[%s3326_s3 + $0x4e0] sm:$0xff] }
  0x16   :  { %357 = vmatprep.subr.mxu1 %v155_v30  ;;  %v269_v56 = vld [vmem:[%s3326_s3 + $0x4b8] sm:$0xff]  ;;  %v268_v57 = vld [vmem:[%s3326_s3 + $0x4b0] sm:$0xff]  ;;  %v263_v58 = vld [vmem:[%s3326_s3 + $0x488] sm:$0xff] }
  0x17   :  { %358 = vmatpush1.msra.mxu1 %v154_v31  ;;  %v262_v59 = vld [vmem:[%s3326_s3 + $0x480] sm:$0xff]  ;;  %v257_v60 = vld [vmem:[%s3326_s3 + $0x458] sm:$0xff]  ;;  %v256_v61 = vld [vmem:[%s3326_s3 + $0x450] sm:$0xff] }
  0x18   :  { %359 = vmatprep.subr.mxu1 %v149_v32  ;;  %v251_v62 = vld [vmem:[%s3326_s3 + $0x428] sm:$0xff]  ;;  %v250_v63 = vld [vmem:[%s3326_s3 + $0x420] sm:$0xff]  ;;  %v245_v0 = vld [vmem:[%s3326_s3 + $0x3f8] sm:$0xff] }
  0x19   :  { %360 = vmatpush1.msra.mxu1 %v148_v33  ;;  %v244_v1 = vld [vmem:[%s3326_s3 + $0x3f0] sm:$0xff]  ;;  %v239_v2 = vld [vmem:[%s3326_s3 + $0x3c8] sm:$0xff]  ;;  %v238_v4 = vld [vmem:[%s3326_s3 + $0x3c0] sm:$0xff] }
  0x1a   :  { %361 = vmatprep.subr.mxu1 %v143_v34  ;;  %v233_v5 = vld [vmem:[%s3326_s3 + $0x398] sm:$0xff]  ;;  %v232_v6 = vld [vmem:[%s3326_s3 + $0x390] sm:$0xff]  ;;  %v227_v7 = vld [vmem:[%s3326_s3 + $0x368] sm:$0xff] }
  0x1b   :  { %362 = vmatpush1.msra.mxu1 %v142_v35  ;;  %v226_v8 = vld [vmem:[%s3326_s3 + $0x360] sm:$0xff]  ;;  %v221_v9 = vld [vmem:[%s3326_s3 + $0x338] sm:$0xff]  ;;  %v220_v10 = vld [vmem:[%s3326_s3 + $0x330] sm:$0xff] }
  0x1c   :  { %363 = vmatprep.subr.mxu1 %v137_v36  ;;  %v215_v11 = vld [vmem:[%s3326_s3 + $0x308] sm:$0xff]  ;;  %v214_v12 = vld [vmem:[%s3326_s3 + $0x300] sm:$0xff]  ;;  %v205_v20 = vld [vmem:[%s3326_s3 + $0x2b8] sm:$0xff] }
  0x1d   :  { %364 = vmatpush1.msra.mxu1 %v136_v37  ;;  %v310_v16 = vld [vmem:[%s3326_s3 + $0x600] sm:$0x1]  ;;  %v211_v18 = vld [vmem:[%s3326_s3 + $0x2e8] sm:$0xff]  ;;  %v204_v22 = vld [vmem:[%s3326_s3 + $0x2b0] sm:$0xff] }
  0x1e   :  { %365 = vmatprep.subr.mxu1 %v131_v38  ;;  %v210_v19 = vld [vmem:[%s3326_s3 + $0x2e0] sm:$0xff]  ;;  %v199_v23 = vld [vmem:[%s3326_s3 + $0x288] sm:$0xff]  ;;  %v193_v25 = vld [vmem:[%s3326_s3 + $0x258] sm:$0xff] }
  0x1f   :  { %366 = vmatpush1.msra.mxu1 %v130_v39  ;;  %v198_v24 = vld [vmem:[%s3326_s3 + $0x280] sm:$0xff]  ;;  %v192_v26 = vld [vmem:[%s3326_s3 + $0x250] sm:$0xff]  ;;  %v187_v27 = vld [vmem:[%s3326_s3 + $0x228] sm:$0xff] }
  0x20   :  { %367 = vmatprep.subr.mxu1 %v125_v40  ;;  %v186_v28 = vld [vmem:[%s3326_s3 + $0x220] sm:$0xff]  ;;  %v181_v29 = vld [vmem:[%s3326_s3 + $0x1f8] sm:$0xff]  ;;  %v180_v30 = vld [vmem:[%s3326_s3 + $0x1f0] sm:$0xff] }
  0x21   :  { %368 = vmatpush1.msra.mxu1 %v124_v41  ;;  %v175_v31 = vld [vmem:[%s3326_s3 + $0x1c8] sm:$0xff]  ;;  %v174_v32 = vld [vmem:[%s3326_s3 + $0x1c0] sm:$0xff]  ;;  %v169_v33 = vld [vmem:[%s3326_s3 + $0x198] sm:$0xff] }
  0x22   :  { %369 = vmatprep.subr.mxu1 %v119_v42  ;;  %v168_v34 = vld [vmem:[%s3326_s3 + $0x190] sm:$0xff]  ;;  %v163_v35 = vld [vmem:[%s3326_s3 + $0x168] sm:$0xff]  ;;  %v162_v36 = vld [vmem:[%s3326_s3 + $0x160] sm:$0xff] }
  0x23   :  { %370 = vmatpush1.msra.mxu1 %v118_v43  ;;  %v157_v37 = vld [vmem:[%s3326_s3 + $0x138] sm:$0xff]  ;;  %v156_v38 = vld [vmem:[%s3326_s3 + $0x130] sm:$0xff]  ;;  %v151_v39 = vld [vmem:[%s3326_s3 + $0x108] sm:$0xff] }
  0x24   :  { %371 = vmatprep.subr.mxu1 %v305_v44  ;;  %v150_v40 = vld [vmem:[%s3326_s3 + $0x100] sm:$0xff]  ;;  %v145_v41 = vld [vmem:[%s3326_s3 + $0xd8] sm:$0xff]  ;;  %v144_v42 = vld [vmem:[%s3326_s3 + $0xd0] sm:$0xff] }
  0x25   :  { %372 = vmatpush2.msra.mxu1 %v304_v45  ;;  %v139_v43 = vld [vmem:[%s3326_s3 + $0xa8] sm:$0xff]  ;;  %v138_v44 = vld [vmem:[%s3326_s3 + $0xa0] sm:$0xff]  ;;  %v133_v45 = vld [vmem:[%s3326_s3 + $0x78] sm:$0xff] }
  0x26   :  { %373 = vmatprep.subr.mxu1 %v299_v46  ;;  %v132_v46 = vld [vmem:[%s3326_s3 + $0x70] sm:$0xff]  ;;  %v234_v13 = vld [vmem:[%s3326_s3 + $0x3a0] sm:$0xff] }
  0x27   :  { %374 = vmatpush2.msra.mxu1 %v298_v47  ;;  %v127_v47 = vld [vmem:[%s3326_s3 + $0x48] sm:$0xff] }
  0x28   :  { %375 = vmatprep.subr.mxu1 %v293_v48  ;;  %v126_v48 = vld [vmem:[%s3326_s3 + $0x40] sm:$0xff] }
  0x29   :  { %376 = vmatpush2.msra.mxu1 %v292_v49  ;;  %v121_v49 = vld [vmem:[%s3326_s3 + $0x18] sm:$0xff] }
  0x2a   :  { %377 = vmatprep.subr.mxu1 %v287_v50  ;;  %v120_v50 = vld [vmem:[%s3326_s3 + $0x10] sm:$0xff] }
  0x2b   :  { %378 = vmatpush2.msra.mxu1 %v286_v51  ;;  %v307_v51 = vld [vmem:[%s3326_s3 + $0x5e8] sm:$0xff] }
  0x2c   :  { %379 = vmatprep.subr.mxu1 %v281_v52  ;;  %v306_v52 = vld [vmem:[%s3326_s3 + $0x5e0] sm:$0xff] }
  0x2d   :  { %380 = vmatpush2.msra.mxu1 %v280_v53  ;;  %v301_v53 = vld [vmem:[%s3326_s3 + $0x5b8] sm:$0xff] }
  0x2e   :  { %381 = vmatprep.subr.mxu1 %v275_v54  ;;  %v300_v54 = vld [vmem:[%s3326_s3 + $0x5b0] sm:$0xff] }
  0x2f   :  { %382 = vmatpush2.msra.mxu1 %v274_v55  ;;  %v295_v55 = vld [vmem:[%s3326_s3 + $0x588] sm:$0xff] }
  0x30   :  { %383 = vmatprep.subr.mxu1 %v269_v56  ;;  %v294_v56 = vld [vmem:[%s3326_s3 + $0x580] sm:$0xff] }
  0x31   :  { %384 = vmatpush2.msra.mxu1 %v268_v57  ;;  %v289_v57 = vld [vmem:[%s3326_s3 + $0x558] sm:$0xff] }
  0x32   :  { %385 = vmatprep.subr.mxu1 %v263_v58  ;;  %v288_v58 = vld [vmem:[%s3326_s3 + $0x550] sm:$0xff] }
  0x33   :  { %386 = vmatpush2.msra.mxu1 %v262_v59  ;;  %v283_v59 = vld [vmem:[%s3326_s3 + $0x528] sm:$0xff] }
  0x34   :  { %387 = vmatprep.subr.mxu1 %v257_v60  ;;  %v282_v60 = vld [vmem:[%s3326_s3 + $0x520] sm:$0xff] }
  0x35   :  { %388 = vmatpush2.msra.mxu1 %v256_v61  ;;  %v277_v61 = vld [vmem:[%s3326_s3 + $0x4f8] sm:$0xff] }
  0x36   :  { %389 = vmatprep.subr.mxu1 %v251_v62  ;;  %v276_v62 = vld [vmem:[%s3326_s3 + $0x4f0] sm:$0xff] }
  0x37   :  { %390 = vmatpush2.msra.mxu1 %v250_v63  ;;  %v271_v63 = vld [vmem:[%s3326_s3 + $0x4c8] sm:$0xff] }
  0x38   :  { %391 = vmatprep.subr.mxu1 %v245_v0  ;;  %v270_v0 = vld [vmem:[%s3326_s3 + $0x4c0] sm:$0xff] }
  0x39   :  { %392 = vmatpush2.msra.mxu1 %v244_v1  ;;  %v265_v1 = vld [vmem:[%s3326_s3 + $0x498] sm:$0xff] }
  0x3a   :  { %393 = vmatprep.subr.mxu1 %v239_v2  ;;  %v264_v2 = vld [vmem:[%s3326_s3 + $0x490] sm:$0xff] }
  0x3b   :  { %394 = vmatpush2.msra.mxu1 %v238_v4  ;;  %v259_v4 = vld [vmem:[%s3326_s3 + $0x468] sm:$0xff] }
  0x3c   :  { %395 = vmatprep.subr.mxu1 %v233_v5  ;;  %v258_v5 = vld [vmem:[%s3326_s3 + $0x460] sm:$0xff] }
  0x3d   :  { %396 = vmatpush2.msra.mxu1 %v232_v6  ;;  %v253_v6 = vld [vmem:[%s3326_s3 + $0x438] sm:$0xff] }
  0x3e   :  { %397 = vmatprep.subr.mxu1 %v227_v7  ;;  %v252_v7 = vld [vmem:[%s3326_s3 + $0x430] sm:$0xff] }
  0x3f   :  { %398 = vmatpush2.msra.mxu1 %v226_v8  ;;  %v247_v8 = vld [vmem:[%s3326_s3 + $0x408] sm:$0xff] }
  0x40   :  { %399 = vmatprep.subr.mxu1 %v221_v9  ;;  %v246_v9 = vld [vmem:[%s3326_s3 + $0x400] sm:$0xff] }
  0x41   :  { %400 = vmatpush2.msra.mxu1 %v220_v10  ;;  %v241_v10 = vld [vmem:[%s3326_s3 + $0x3d8] sm:$0xff] }
  0x42   :  { %401 = vmatprep.subr.mxu1 %v215_v11  ;;  %v240_v11 = vld [vmem:[%s3326_s3 + $0x3d0] sm:$0xff] }
  0x43   :  { %402 = vmatpush2.msra.mxu1 %v214_v12  ;;  %v235_v12 = vld [vmem:[%s3326_s3 + $0x3a8] sm:$0xff] }
  0x7d   :  { %v29_v15 = vpop.permute.xlu0 %28 }
  0x7e   :  { %vm30_vm3 = vcmp.eq.s32.totalorder %v25_v14, %v29_v15  ;;  %v229_v14 = vld [vmem:[%s3326_s3 + $0x378] sm:$0xff]  ;;  %v228_v15 = vld [vmem:[%s3326_s3 + $0x370] sm:$0xff] }
  0x7f   :  { %v1577_v17 = vsel %vm30_vm3, 1.0, %v1910_v3 }
  0x80   :  { %1834 = vmatmul.mubr.msk.f32.vlgmr.msra.gmra.mxu0 %vm41_vm2, %v1577_v17  ;;  %v222_v17 = vld [vmem:[%s3326_s3 + $0x340] sm:$0xff] }
  0x81   :  { %1581 = vmatpush1.msk.msra.mxu0 %vm320_vm1, %v310_v16  ;;  %474 = vmatprep.mubr.f32.mxu0 %v1910_v3  ;;  %v223_v16 = vld [vmem:[%s3326_s3 + $0x348] sm:$0xff] }
  0x82   :  { %481 = vmatprep.subr.mxu0 %v211_v18  ;;  %v217_v18 = vld [vmem:[%s3326_s3 + $0x318] sm:$0xff] }
  0x84   :  { %1582 = vmatmul.mubr.msk.f32.vlgmr.msra.gmra.mxu0 %vm316_vm4, %v1912_v21 }
  0x85   :  { %482 = vmatpush1.msra.mxu0 %v210_v19  ;;  %v2384_v19 = vld [vmem:[%s3325_s2] sm:$0xff] }
  0x86   :  { %483 = vmatprep.subr.mxu0 %v205_v20  ;;  %v213_v20 = vld [vmem:[%s3326_s3 + $0x2f8] sm:$0xff]  ;;  %1579 = vmatprep.mubr.msk.f32.mxu1 %vm116_vm5, %v2384_v19 }
  0x87   :  { %484 = vmatpush1.msra.mxu0 %v204_v22  ;;  %v216_v22 = vld [vmem:[%s3326_s3 + $0x310] sm:$0xff]  ;;  %1583 = vmatprep.mubr.msk.f32.mxu0 %vm116_vm5, %v2384_v19 }
  0x88   :  { %485 = vmatprep.subr.mxu0 %v199_v23  ;;  %623 = vmatprep.subr.mxu1 %v213_v20  ;;  %v313_v23 = vld [vmem:[%s3326_s3 + $0x618] sm:$0x1]  ;;  %v243_v20 = vld [vmem:[%s3326_s3 + $0x3e8] sm:$0xff] }
  0x89   :  { %486 = vmatpush1.msra.mxu0 %v198_v24  ;;  %v212_v24 = vld [vmem:[%s3326_s3 + $0x2f0] sm:$0xff] }
  0x8a   :  { %487 = vmatprep.subr.mxu0 %v193_v25  ;;  %v312_v25 = vld [vmem:[%s3326_s3 + $0x610] sm:$0x1] }
  0x8b   :  { %488 = vmatpush1.msra.mxu0 %v192_v26 }
  0x8c   :  { %489 = vmatprep.subr.mxu0 %v187_v27  ;;  %v207_v27 = vld [vmem:[%s3326_s3 + $0x2c8] sm:$0xff] }
  0x8d   :  { %490 = vmatpush1.msra.mxu0 %v186_v28  ;;  %v206_v28 = vld [vmem:[%s3326_s3 + $0x2c0] sm:$0xff] }
  0x8e   :  { %491 = vmatprep.subr.mxu0 %v181_v29  ;;  %v315_v29 = vld [vmem:[%s3326_s3 + $0x628] sm:$0x1] }
  0x8f   :  { %492 = vmatpush1.msra.mxu0 %v180_v30 }
  0x90   :  { %493 = vmatprep.subr.mxu0 %v175_v31  ;;  %v201_v31 = vld [vmem:[%s3326_s3 + $0x298] sm:$0xff] }
  0x91   :  { %494 = vmatpush1.msra.mxu0 %v174_v32  ;;  %v200_v32 = vld [vmem:[%s3326_s3 + $0x290] sm:$0xff] }
  0x92   :  { %495 = vmatprep.subr.mxu0 %v169_v33  ;;  %v314_v33 = vld [vmem:[%s3326_s3 + $0x620] sm:$0x1] }
  0x93   :  { %496 = vmatpush1.msra.mxu0 %v168_v34  ;;  %v195_v34 = vld [vmem:[%s3326_s3 + $0x268] sm:$0xff] }
  0x94   :  { %497 = vmatprep.subr.mxu0 %v163_v35  ;;  %v194_v35 = vld [vmem:[%s3326_s3 + $0x260] sm:$0xff] }
  0x95   :  { %498 = vmatpush1.msra.mxu0 %v162_v36  ;;  %v189_v36 = vld [vmem:[%s3326_s3 + $0x238] sm:$0xff] }
  0x96   :  { %499 = vmatprep.subr.mxu0 %v157_v37  ;;  %v188_v37 = vld [vmem:[%s3326_s3 + $0x230] sm:$0xff] }
  0x97   :  { %500 = vmatpush1.msra.mxu0 %v156_v38  ;;  %v183_v38 = vld [vmem:[%s3326_s3 + $0x208] sm:$0xff] }
  0x98   :  { %501 = vmatprep.subr.mxu0 %v151_v39  ;;  %v182_v39 = vld [vmem:[%s3326_s3 + $0x200] sm:$0xff] }
  0x99   :  { %502 = vmatpush1.msra.mxu0 %v150_v40  ;;  %v177_v40 = vld [vmem:[%s3326_s3 + $0x1d8] sm:$0xff] }
  0x9a   :  { %503 = vmatprep.subr.mxu0 %v145_v41  ;;  %v176_v41 = vld [vmem:[%s3326_s3 + $0x1d0] sm:$0xff] }
  0x9b   :  { %504 = vmatpush1.msra.mxu0 %v144_v42  ;;  %v171_v42 = vld [vmem:[%s3326_s3 + $0x1a8] sm:$0xff] }
  0x9c   :  { %505 = vmatprep.subr.mxu0 %v139_v43  ;;  %v170_v43 = vld [vmem:[%s3326_s3 + $0x1a0] sm:$0xff] }
  0x9d   :  { %506 = vmatpush1.msra.mxu0 %v138_v44  ;;  %v165_v44 = vld [vmem:[%s3326_s3 + $0x178] sm:$0xff] }
  0x9e   :  { %507 = vmatprep.subr.mxu0 %v133_v45  ;;  %v164_v45 = vld [vmem:[%s3326_s3 + $0x170] sm:$0xff] }
  0x9f   :  { %508 = vmatpush1.msra.mxu0 %v132_v46  ;;  %v159_v46 = vld [vmem:[%s3326_s3 + $0x148] sm:$0xff] }
  0xa0   :  { %509 = vmatprep.subr.mxu0 %v127_v47  ;;  %v158_v47 = vld [vmem:[%s3326_s3 + $0x140] sm:$0xff] }
  0xa1   :  { %510 = vmatpush1.msra.mxu0 %v126_v48  ;;  %v153_v48 = vld [vmem:[%s3326_s3 + $0x118] sm:$0xff] }
  0xa2   :  { %511 = vmatprep.subr.mxu0 %v121_v49  ;;  %v152_v49 = vld [vmem:[%s3326_s3 + $0x110] sm:$0xff] }
  0xa3   :  { %512 = vmatpush1.msra.mxu0 %v120_v50  ;;  %v147_v50 = vld [vmem:[%s3326_s3 + $0xe8] sm:$0xff] }
  0xa4   :  { %513 = vmatprep.subr.mxu0 %v307_v51  ;;  %v146_v51 = vld [vmem:[%s3326_s3 + $0xe0] sm:$0xff] }
  0xa5   :  { %514 = vmatpush2.msra.mxu0 %v306_v52  ;;  %v141_v52 = vld [vmem:[%s3326_s3 + $0xb8] sm:$0xff] }
  0xa6   :  { %515 = vmatprep.subr.mxu0 %v301_v53  ;;  %v140_v53 = vld [vmem:[%s3326_s3 + $0xb0] sm:$0xff] }
  0xa7   :  { %516 = vmatpush2.msra.mxu0 %v300_v54  ;;  %v135_v54 = vld [vmem:[%s3326_s3 + $0x88] sm:$0xff] }
  0xa8   :  { %517 = vmatprep.subr.mxu0 %v295_v55  ;;  %v134_v55 = vld [vmem:[%s3326_s3 + $0x80] sm:$0xff] }
  0xa9   :  { %518 = vmatpush2.msra.mxu0 %v294_v56  ;;  %v129_v56 = vld [vmem:[%s3326_s3 + $0x58] sm:$0xff] }
  0xaa   :  { %519 = vmatprep.subr.mxu0 %v289_v57  ;;  %v128_v57 = vld [vmem:[%s3326_s3 + $0x50] sm:$0xff] }
  0xab   :  { %520 = vmatpush2.msra.mxu0 %v288_v58  ;;  %v123_v58 = vld [vmem:[%s3326_s3 + $0x28] sm:$0xff] }
  0xac   :  { %521 = vmatprep.subr.mxu0 %v283_v59  ;;  %v122_v59 = vld [vmem:[%s3326_s3 + $0x20] sm:$0xff] }
  0xad   :  { %522 = vmatpush2.msra.mxu0 %v282_v60  ;;  %v309_v60 = vld [vmem:[%s3326_s3 + $0x5f8] sm:$0xff] }
  0xae   :  { %523 = vmatprep.subr.mxu0 %v277_v61  ;;  %v308_v61 = vld [vmem:[%s3326_s3 + $0x5f0] sm:$0xff] }
  0xaf   :  { %524 = vmatpush2.msra.mxu0 %v276_v62  ;;  %v303_v62 = vld [vmem:[%s3326_s3 + $0x5c8] sm:$0xff] }
  0xb0   :  { %525 = vmatprep.subr.mxu0 %v271_v63  ;;  %v302_v63 = vld [vmem:[%s3326_s3 + $0x5c0] sm:$0xff] }
  0xb1   :  { %526 = vmatpush2.msra.mxu0 %v270_v0  ;;  %v297_v0 = vld [vmem:[%s3326_s3 + $0x598] sm:$0xff] }
  0xb2   :  { %527 = vmatprep.subr.mxu0 %v265_v1  ;;  %v296_v1 = vld [vmem:[%s3326_s3 + $0x590] sm:$0xff] }
  0xb3   :  { %528 = vmatpush2.msra.mxu0 %v264_v2  ;;  %v291_v2 = vld [vmem:[%s3326_s3 + $0x568] sm:$0xff] }
  0xb4   :  { %529 = vmatprep.subr.mxu0 %v259_v4  ;;  %v290_v4 = vld [vmem:[%s3326_s3 + $0x560] sm:$0xff] }
  0xb5   :  { %530 = vmatpush2.msra.mxu0 %v258_v5  ;;  %v285_v5 = vld [vmem:[%s3326_s3 + $0x538] sm:$0xff] }
  0xb6   :  { %531 = vmatprep.subr.mxu0 %v253_v6  ;;  %v284_v6 = vld [vmem:[%s3326_s3 + $0x530] sm:$0xff] }
  0xb7   :  { %532 = vmatpush2.msra.mxu0 %v252_v7  ;;  %v279_v7 = vld [vmem:[%s3326_s3 + $0x508] sm:$0xff] }
  0xb8   :  { %533 = vmatprep.subr.mxu0 %v247_v8  ;;  %v278_v8 = vld [vmem:[%s3326_s3 + $0x500] sm:$0xff] }
  0xb9   :  { %534 = vmatpush2.msra.mxu0 %v246_v9  ;;  %v273_v9 = vld [vmem:[%s3326_s3 + $0x4d8] sm:$0xff] }
  0xba   :  { %535 = vmatprep.subr.mxu0 %v241_v10  ;;  %v272_v10 = vld [vmem:[%s3326_s3 + $0x4d0] sm:$0xff] }
  0xbb   :  { %536 = vmatpush2.msra.mxu0 %v240_v11  ;;  %v267_v11 = vld [vmem:[%s3326_s3 + $0x4a8] sm:$0xff] }
  0xbc   :  { %537 = vmatprep.subr.mxu0 %v235_v12  ;;  %v266_v12 = vld [vmem:[%s3326_s3 + $0x4a0] sm:$0xff] }
  0xbd   :  { %538 = vmatpush2.msra.mxu0 %v234_v13  ;;  %v261_v13 = vld [vmem:[%s3326_s3 + $0x478] sm:$0xff] }
  0xbe   :  { %539 = vmatprep.subr.mxu0 %v229_v14  ;;  %v260_v14 = vld [vmem:[%s3326_s3 + $0x470] sm:$0xff] }
  0xbf   :  { %540 = vmatpush2.msra.mxu0 %v228_v15  ;;  %v255_v15 = vld [vmem:[%s3326_s3 + $0x448] sm:$0xff] }
  0xc0   :  { %541 = vmatprep.subr.mxu0 %v223_v16  ;;  %v254_v16 = vld [vmem:[%s3326_s3 + $0x440] sm:$0xff] }
  0xc1   :  { %542 = vmatpush2.msra.mxu0 %v222_v17  ;;  %v249_v17 = vld [vmem:[%s3326_s3 + $0x418] sm:$0xff] }
  0xc2   :  { %543 = vmatprep.subr.mxu0 %v217_v18  ;;  %v248_v18 = vld [vmem:[%s3326_s3 + $0x410] sm:$0xff] }
  0xc3   :  { %544 = vmatpush2.msra.mxu0 %v216_v22  ;;  %v242_v22 = vld [vmem:[%s3326_s3 + $0x3e0] sm:$0xff] }
  0xc4   :  { %1584 = vmatprep.subr.msk.mxu0 %vm320_vm1, %v313_v23  ;;  %v237_v23 = vld [vmem:[%s3326_s3 + $0x3b8] sm:$0xff] }
 0x140   :  { %v2406_v26 = vpop.f32.mrf.mxu0 }
 0x141   :  { %404 = vmatmul.mubr.f32.vlgmr.msra.gmra.mxu1 %v2406_v26  ;;  %546 = vmatmul.mubr.f32.vlgmr.msra.gmra.mxu0 %v2406_v26 }
 0x142   :  { %624 = vmatpush1.msra.mxu1 %v212_v24  ;;  %v1835_v30 = vpop.f32.mrf.mxu0  ;;  %1585 = vmatpush1.msk.msra.mxu0 %vm320_vm1, %v312_v25  ;;  %v236_v24 = vld [vmem:[%s3326_s3 + $0x3b0] sm:$0xff]  ;;  %v231_v25 = vld [vmem:[%s3326_s3 + $0x388] sm:$0xff] }
 0x143   :  { %625 = vmatprep.subr.mxu1 %v207_v27  ;;  %616 = vmatprep.mubr.f32.mxu0 %v1910_v3  ;;  %v230_v27 = vld [vmem:[%s3326_s3 + $0x380] sm:$0xff]  ;;  %v219_v30 = vld [vmem:[%s3326_s3 + $0x328] sm:$0xff] }
 0x144   :  { %626 = vmatpush1.msra.mxu1 %v206_v28  ;;  %1588 = vmatprep.subr.msk.mxu0 %vm320_vm1, %v315_v29  ;;  %v225_v28 = vld [vmem:[%s3326_s3 + $0x358] sm:$0xff]  ;;  %v224_v29 = vld [vmem:[%s3326_s3 + $0x350] sm:$0xff] }
 0x145   :  { %627 = vmatprep.subr.mxu1 %v201_v31  ;;  %1586 = vmatmul.mubr.msk.f32.vlgmr.msra.gmra.mxu0 %vm316_vm4, %v1912_v21  ;;  %v218_v31 = vld [vmem:[%s3326_s3 + $0x320] sm:$0xff] }
 0x146   :  { %628 = vmatpush1.msra.mxu1 %v200_v32  ;;  %1589 = vmatpush1.msk.msra.mxu0 %vm320_vm1, %v314_v33  ;;  %v1685_v32 = vld [vmem:[%s3326_s3 + $0x908] sm:$0xff]  ;;  %v1684_v33 = vld [vmem:[%s3326_s3 + $0x900] sm:$0xff] }
 0x147   :  { %629 = vmatprep.subr.mxu1 %v195_v34  ;;  %758 = vmatprep.mubr.f32.mxu0 %v1910_v3  ;;  %v1687_v34 = vld [vmem:[%s3326_s3 + $0x918] sm:$0xff] }
 0x148   :  { %630 = vmatpush1.msra.mxu1 %v194_v35  ;;  %1587 = vmatprep.mubr.msk.f32.mxu1 %vm116_vm5, %v2384_v19  ;;  %v1679_v35 = vld [vmem:[%s3326_s3 + $0x8d8] sm:$0xff] }
 0x149   :  { %631 = vmatprep.subr.mxu1 %v189_v36  ;;  %1590 = vmatmul.mubr.msk.f32.vlgmr.msra.gmra.mxu0 %vm316_vm4, %v1912_v21  ;;  %v1678_v36 = vld [vmem:[%s3326_s3 + $0x8d0] sm:$0xff] }
 0x14a   :  { %632 = vmatpush1.msra.mxu1 %v188_v37  ;;  %1007 = vmatprep.subr.mxu0 %v1685_v32  ;;  %v1681_v37 = vld [vmem:[%s3326_s3 + $0x8e8] sm:$0xff] }
 0x14b   :  { %633 = vmatprep.subr.mxu1 %v183_v38  ;;  %1008 = vmatpush1.msra.mxu0 %v1684_v33  ;;  %v1673_v38 = vld [vmem:[%s3326_s3 + $0x8a8] sm:$0xff]  ;;  %v1594_v33 = vld [vmem:[%s3326_s3 + $0x630] sm:$0xff] }
 0x14c   :  { %634 = vmatpush1.msra.mxu1 %v182_v39  ;;  %v1680_v39 = vld [vmem:[%s3326_s3 + $0x8e0] sm:$0xff]  ;;  %1009 = vmatprep.subr.mxu0 %v1679_v35  ;;  %v1597_v32 = vld [vmem:[%s3326_s3 + $0x648] sm:$0xff] }
 0x14d   :  { %635 = vmatprep.subr.mxu1 %v177_v40  ;;  %v1672_v40 = vld [vmem:[%s3326_s3 + $0x8a0] sm:$0xff]  ;;  %1010 = vmatpush1.msra.mxu0 %v1678_v36  ;;  %v1781_v35 = vld [vmem:[%s3326_s3 + $0xc08] sm:$0xff] }
 0x14e   :  { %636 = vmatpush1.msra.mxu1 %v176_v41  ;;  %v1675_v41 = vld [vmem:[%s3326_s3 + $0x8b8] sm:$0xff]  ;;  %1011 = vmatprep.subr.mxu0 %v1673_v38  ;;  %v1780_v36 = vld [vmem:[%s3326_s3 + $0xc00] sm:$0xff] }
 0x14f   :  { %637 = vmatprep.subr.mxu1 %v171_v42  ;;  %v1667_v42 = vld [vmem:[%s3326_s3 + $0x878] sm:$0xff]  ;;  %1012 = vmatpush1.msra.mxu0 %v1672_v40  ;;  %v1774_v40 = vld [vmem:[%s3326_s3 + $0xbd0] sm:$0xff] }
 0x150   :  { %638 = vmatpush1.msra.mxu1 %v170_v43  ;;  %v1674_v43 = vld [vmem:[%s3326_s3 + $0x8b0] sm:$0xff]  ;;  %1013 = vmatprep.subr.mxu0 %v1667_v42  ;;  %v1775_v38 = vld [vmem:[%s3326_s3 + $0xbd8] sm:$0xff]  ;;  %v1769_v42 = vld [vmem:[%s3326_s3 + $0xba8] sm:$0xff] }
 0x151   :  { %639 = vmatprep.subr.mxu1 %v165_v44  ;;  %v1669_v44 = vld [vmem:[%s3326_s3 + $0x888] sm:$0xff] }
 0x152   :  { %640 = vmatpush1.msra.mxu1 %v164_v45  ;;  %v1666_v45 = vld [vmem:[%s3326_s3 + $0x870] sm:$0xff] }
 0x153   :  { %641 = vmatprep.subr.mxu1 %v159_v46  ;;  %v1668_v46 = vld [vmem:[%s3326_s3 + $0x880] sm:$0xff]  ;;  %1014 = vmatpush1.msra.mxu0 %v1666_v45  ;;  %v1770_v45 = vld [vmem:[%s3326_s3 + $0xbb0] sm:$0xff] }
 0x154   :  { %642 = vmatpush1.msra.mxu1 %v158_v47  ;;  %v1661_v47 = vld [vmem:[%s3326_s3 + $0x848] sm:$0xff] }
 0x155   :  { %643 = vmatprep.subr.mxu1 %v153_v48  ;;  %v1663_v48 = vld [vmem:[%s3326_s3 + $0x858] sm:$0xff]  ;;  %1015 = vmatprep.subr.mxu0 %v1661_v47  ;;  %v1765_v47 = vld [vmem:[%s3326_s3 + $0xb88] sm:$0xff] }
 0x156   :  { %644 = vmatpush1.msra.mxu1 %v152_v49  ;;  %v1660_v49 = vld [vmem:[%s3326_s3 + $0x840] sm:$0xff] }
 0x157   :  { %645 = vmatprep.subr.mxu1 %v147_v50  ;;  %v1662_v50 = vld [vmem:[%s3326_s3 + $0x850] sm:$0xff]  ;;  %1016 = vmatpush1.msra.mxu0 %v1660_v49  ;;  %v1764_v49 = vld [vmem:[%s3326_s3 + $0xb80] sm:$0xff] }
 0x158   :  { %646 = vmatpush1.msra.mxu1 %v146_v51  ;;  %v1655_v51 = vld [vmem:[%s3326_s3 + $0x818] sm:$0xff] }
 0x159   :  { %647 = vmatprep.subr.mxu1 %v141_v52  ;;  %v1657_v52 = vld [vmem:[%s3326_s3 + $0x828] sm:$0xff]  ;;  %1017 = vmatprep.subr.mxu0 %v1655_v51  ;;  %v1759_v51 = vld [vmem:[%s3326_s3 + $0xb58] sm:$0xff] }
 0x15a   :  { %648 = vmatpush1.msra.mxu1 %v140_v53  ;;  %v1654_v53 = vld [vmem:[%s3326_s3 + $0x810] sm:$0xff] }
 0x15b   :  { %649 = vmatprep.subr.mxu1 %v135_v54  ;;  %v1656_v54 = vld [vmem:[%s3326_s3 + $0x820] sm:$0xff]  ;;  %1018 = vmatpush1.msra.mxu0 %v1654_v53  ;;  %v1758_v53 = vld [vmem:[%s3326_s3 + $0xb50] sm:$0xff] }
 0x15c   :  { %650 = vmatpush1.msra.mxu1 %v134_v55  ;;  %v1649_v55 = vld [vmem:[%s3326_s3 + $0x7e8] sm:$0xff] }
 0x15d   :  { %651 = vmatprep.subr.mxu1 %v129_v56  ;;  %v1651_v56 = vld [vmem:[%s3326_s3 + $0x7f8] sm:$0xff]  ;;  %1019 = vmatprep.subr.mxu0 %v1649_v55  ;;  %v1753_v55 = vld [vmem:[%s3326_s3 + $0xb28] sm:$0xff] }
 0x15e   :  { %652 = vmatpush1.msra.mxu1 %v128_v57  ;;  %v1648_v57 = vld [vmem:[%s3326_s3 + $0x7e0] sm:$0xff] }
 0x15f   :  { %653 = vmatprep.subr.mxu1 %v123_v58  ;;  %v1650_v58 = vld [vmem:[%s3326_s3 + $0x7f0] sm:$0xff]  ;;  %1020 = vmatpush1.msra.mxu0 %v1648_v57  ;;  %v1752_v57 = vld [vmem:[%s3326_s3 + $0xb20] sm:$0xff] }
 0x160   :  { %654 = vmatpush1.msra.mxu1 %v122_v59  ;;  %v1643_v59 = vld [vmem:[%s3326_s3 + $0x7b8] sm:$0xff] }
 0x161   :  { %655 = vmatprep.subr.mxu1 %v309_v60  ;;  %v1645_v60 = vld [vmem:[%s3326_s3 + $0x7c8] sm:$0xff]  ;;  %1021 = vmatprep.subr.mxu0 %v1643_v59  ;;  %v1747_v59 = vld [vmem:[%s3326_s3 + $0xaf8] sm:$0xff] }
 0x162   :  { %656 = vmatpush2.msra.mxu1 %v308_v61  ;;  %v1642_v61 = vld [vmem:[%s3326_s3 + $0x7b0] sm:$0xff] }
 0x163   :  { %657 = vmatprep.subr.mxu1 %v303_v62  ;;  %v1644_v62 = vld [vmem:[%s3326_s3 + $0x7c0] sm:$0xff]  ;;  %1022 = vmatpush1.msra.mxu0 %v1642_v61  ;;  %v1739_v61 = vld [vmem:[%s3326_s3 + $0xab8] sm:$0xff] }
 0x164   :  { %658 = vmatpush2.msra.mxu1 %v302_v63  ;;  %v1637_v63 = vld [vmem:[%s3326_s3 + $0x788] sm:$0xff] }
 0x165   :  { %659 = vmatprep.subr.mxu1 %v297_v0  ;;  %v1639_v0 = vld [vmem:[%s3326_s3 + $0x798] sm:$0xff]  ;;  %1023 = vmatprep.subr.mxu0 %v1637_v63  ;;  %v1738_v63 = vld [vmem:[%s3326_s3 + $0xab0] sm:$0xff] }
 0x166   :  { %660 = vmatpush2.msra.mxu1 %v296_v1  ;;  %v1636_v1 = vld [vmem:[%s3326_s3 + $0x780] sm:$0xff] }
 0x167   :  { %661 = vmatprep.subr.mxu1 %v291_v2  ;;  %v1638_v2 = vld [vmem:[%s3326_s3 + $0x790] sm:$0xff]  ;;  %1024 = vmatpush1.msra.mxu0 %v1636_v1  ;;  %v1733_v1 = vld [vmem:[%s3326_s3 + $0xa88] sm:$0xff] }
 0x168   :  { %662 = vmatpush2.msra.mxu1 %v290_v4  ;;  %v1631_v4 = vld [vmem:[%s3326_s3 + $0x758] sm:$0xff] }
 0x169   :  { %663 = vmatprep.subr.mxu1 %v285_v5  ;;  %v1633_v5 = vld [vmem:[%s3326_s3 + $0x768] sm:$0xff]  ;;  %1025 = vmatprep.subr.mxu0 %v1631_v4  ;;  %v1732_v4 = vld [vmem:[%s3326_s3 + $0xa80] sm:$0xff] }
 0x16a   :  { %664 = vmatpush2.msra.mxu1 %v284_v6  ;;  %v1630_v6 = vld [vmem:[%s3326_s3 + $0x750] sm:$0xff] }
 0x16b   :  { %665 = vmatprep.subr.mxu1 %v279_v7  ;;  %v1632_v7 = vld [vmem:[%s3326_s3 + $0x760] sm:$0xff]  ;;  %1026 = vmatpush1.msra.mxu0 %v1630_v6  ;;  %v1727_v6 = vld [vmem:[%s3326_s3 + $0xa58] sm:$0xff] }
 0x16c   :  { %666 = vmatpush2.msra.mxu1 %v278_v8  ;;  %v1625_v8 = vld [vmem:[%s3326_s3 + $0x728] sm:$0xff] }
 0x16d   :  { %667 = vmatprep.subr.mxu1 %v273_v9  ;;  %v1627_v9 = vld [vmem:[%s3326_s3 + $0x738] sm:$0xff]  ;;  %1027 = vmatprep.subr.mxu0 %v1625_v8  ;;  %v1726_v8 = vld [vmem:[%s3326_s3 + $0xa50] sm:$0xff] }
 0x16e   :  { %668 = vmatpush2.msra.mxu1 %v272_v10  ;;  %v1624_v10 = vld [vmem:[%s3326_s3 + $0x720] sm:$0xff] }
 0x16f   :  { %669 = vmatprep.subr.mxu1 %v267_v11  ;;  %1028 = vmatpush1.msra.mxu0 %v1624_v10  ;;  %v1626_v11 = vld [vmem:[%s3326_s3 + $0x730] sm:$0xff]  ;;  %v1728_v10 = vld [vmem:[%s3326_s3 + $0xa60] sm:$0xff] }
 0x170   :  { %670 = vmatpush2.msra.mxu1 %v266_v12  ;;  %v1619_v12 = vld [vmem:[%s3326_s3 + $0x6f8] sm:$0xff] }
 0x171   :  { %671 = vmatprep.subr.mxu1 %v261_v13  ;;  %v1621_v13 = vld [vmem:[%s3326_s3 + $0x708] sm:$0xff]  ;;  %1029 = vmatprep.subr.mxu0 %v1619_v12  ;;  %v1723_v12 = vld [vmem:[%s3326_s3 + $0xa38] sm:$0xff] }
 0x172   :  { %672 = vmatpush2.msra.mxu1 %v260_v14  ;;  %v1618_v14 = vld [vmem:[%s3326_s3 + $0x6f0] sm:$0xff] }
 0x173   :  { %673 = vmatprep.subr.mxu1 %v255_v15  ;;  %v1620_v15 = vld [vmem:[%s3326_s3 + $0x700] sm:$0xff]  ;;  %1030 = vmatpush1.msra.mxu0 %v1618_v14  ;;  %v1722_v14 = vld [vmem:[%s3326_s3 + $0xa30] sm:$0xff] }
 0x174   :  { %674 = vmatpush2.msra.mxu1 %v254_v16  ;;  %v1613_v16 = vld [vmem:[%s3326_s3 + $0x6c8] sm:$0xff] }
 0x175   :  { %675 = vmatprep.subr.mxu1 %v249_v17  ;;  %v1615_v17 = vld [vmem:[%s3326_s3 + $0x6d8] sm:$0xff]  ;;  %1031 = vmatprep.subr.mxu0 %v1613_v16  ;;  %v1717_v16 = vld [vmem:[%s3326_s3 + $0xa08] sm:$0xff] }
 0x176   :  { %676 = vmatpush2.msra.mxu1 %v248_v18  ;;  %v1612_v18 = vld [vmem:[%s3326_s3 + $0x6c0] sm:$0xff] }
 0x177   :  { %677 = vmatprep.subr.mxu1 %v243_v20  ;;  %v1614_v20 = vld [vmem:[%s3326_s3 + $0x6d0] sm:$0xff]  ;;  %1032 = vmatpush1.msra.mxu0 %v1612_v18  ;;  %v1716_v18 = vld [vmem:[%s3326_s3 + $0xa00] sm:$0xff] }
 0x178   :  { %678 = vmatpush2.msra.mxu1 %v242_v22  ;;  %v1607_v22 = vld [vmem:[%s3326_s3 + $0x698] sm:$0xff] }
 0x179   :  { %679 = vmatprep.subr.mxu1 %v237_v23  ;;  %v1609_v23 = vld [vmem:[%s3326_s3 + $0x6a8] sm:$0xff]  ;;  %1033 = vmatprep.subr.mxu0 %v1607_v22  ;;  %v1711_v22 = vld [vmem:[%s3326_s3 + $0x9d8] sm:$0xff] }
 0x17a   :  { %680 = vmatpush2.msra.mxu1 %v236_v24  ;;  %v1606_v24 = vld [vmem:[%s3326_s3 + $0x690] sm:$0xff] }
 0x17b   :  { %681 = vmatprep.subr.mxu1 %v231_v25  ;;  %v1608_v25 = vld [vmem:[%s3326_s3 + $0x6a0] sm:$0xff]  ;;  %1034 = vmatpush1.msra.mxu0 %v1606_v24  ;;  %v1710_v24 = vld [vmem:[%s3326_s3 + $0x9d0] sm:$0xff] }
 0x17c   :  { %682 = vmatpush2.msra.mxu1 %v230_v27  ;;  %v1601_v27 = vld [vmem:[%s3326_s3 + $0x668] sm:$0xff] }
 0x17d   :  { %683 = vmatprep.subr.mxu1 %v225_v28  ;;  %v1603_v28 = vld [vmem:[%s3326_s3 + $0x678] sm:$0xff]  ;;  %1035 = vmatprep.subr.mxu0 %v1601_v27  ;;  %v1705_v27 = vld [vmem:[%s3326_s3 + $0x9a8] sm:$0xff] }
 0x17e   :  { %684 = vmatpush2.msra.mxu1 %v224_v29  ;;  %v1600_v29 = vld [vmem:[%s3326_s3 + $0x660] sm:$0xff] }
 0x17f   :  { %685 = vmatprep.subr.mxu1 %v219_v30  ;;  %v1602_v30 = vld [vmem:[%s3326_s3 + $0x670] sm:$0xff]  ;;  %1036 = vmatpush1.msra.mxu0 %v1600_v29  ;;  %v1704_v29 = vld [vmem:[%s3326_s3 + $0x9a0] sm:$0xff] }
 0x180   :  { %686 = vmatpush2.msra.mxu1 %v218_v31  ;;  %v1595_v31 = vld [vmem:[%s3326_s3 + $0x638] sm:$0xff] }
 0x181   :  { %688 = vmatmul.mubr.f32.vlgmr.msra.gmra.mxu1 %v2406_v26  ;;  %1149 = vmatprep.subr.mxu1 %v1687_v34  ;;  %v1686_v26 = vld [vmem:[%s3326_s3 + $0x910] sm:$0xff]  ;;  %v1596_v34 = vld [vmem:[%s3326_s3 + $0x640] sm:$0xff] }
 0x182   :  { %1150 = vmatpush1.msra.mxu1 %v1686_v26  ;;  %1037 = vmatprep.subr.mxu0 %v1595_v31  ;;  %v1783_v26 = vld [vmem:[%s3326_s3 + $0xc18] sm:$0xff] }
 0x183   :  { %1151 = vmatprep.subr.mxu1 %v1681_v37  ;;  %1038 = vmatpush1.msra.mxu0 %v1594_v33  ;;  %v1782_v37 = vld [vmem:[%s3326_s3 + $0xc10] sm:$0xff]  ;;  %v1699_v31 = vld [vmem:[%s3326_s3 + $0x978] sm:$0xff] }
 0x184   :  { %1152 = vmatpush1.msra.mxu1 %v1680_v39  ;;  %1039 = vmatprep.subr.mxu0 %v1781_v35  ;;  %v1777_v39 = vld [vmem:[%s3326_s3 + $0xbe8] sm:$0xff]  ;;  %v1698_v33 = vld [vmem:[%s3326_s3 + $0x970] sm:$0xff] }
 0x185   :  { %1153 = vmatprep.subr.mxu1 %v1675_v41  ;;  %1040 = vmatpush2.msra.mxu0 %v1780_v36  ;;  %v1776_v41 = vld [vmem:[%s3326_s3 + $0xbe0] sm:$0xff]  ;;  %v1693_v35 = vld [vmem:[%s3326_s3 + $0x948] sm:$0xff] }
 0x186   :  { %1154 = vmatpush1.msra.mxu1 %v1674_v43  ;;  %1041 = vmatprep.subr.mxu0 %v1775_v38  ;;  %v1771_v43 = vld [vmem:[%s3326_s3 + $0xbb8] sm:$0xff]  ;;  %v2998_v36 = vld [vmem:[%s3325_s2 + $0x8] sm:$0xff]  ;;  %v1692_v38 = vld [vmem:[%s3326_s3 + $0x940] sm:$0xff] }
 0x187   :  { %1155 = vmatprep.subr.mxu1 %v1669_v44  ;;  %1042 = vmatpush2.msra.mxu0 %v1774_v40  ;;  %v1768_v44 = vld [vmem:[%s3326_s3 + $0xba0] sm:$0xff] }
 0x188   :  { %1156 = vmatpush1.msra.mxu1 %v1668_v46  ;;  %1043 = vmatprep.subr.mxu0 %v1769_v42  ;;  %v1763_v46 = vld [vmem:[%s3326_s3 + $0xb78] sm:$0xff] }
 0x189   :  { %1157 = vmatprep.subr.mxu1 %v1663_v48  ;;  %1044 = vmatpush2.msra.mxu0 %v1768_v44  ;;  %v1762_v48 = vld [vmem:[%s3326_s3 + $0xb70] sm:$0xff] }
 0x18a   :  { %1158 = vmatpush1.msra.mxu1 %v1662_v50  ;;  %1045 = vmatprep.subr.mxu0 %v1763_v46  ;;  %v1757_v50 = vld [vmem:[%s3326_s3 + $0xb48] sm:$0xff] }
 0x18b   :  { %1159 = vmatprep.subr.mxu1 %v1657_v52  ;;  %1046 = vmatpush2.msra.mxu0 %v1762_v48  ;;  %v1756_v52 = vld [vmem:[%s3326_s3 + $0xb40] sm:$0xff] }
 0x18c   :  { %1160 = vmatpush1.msra.mxu1 %v1656_v54  ;;  %1047 = vmatprep.subr.mxu0 %v1757_v50  ;;  %v1751_v54 = vld [vmem:[%s3326_s3 + $0xb18] sm:$0xff] }
 0x18d   :  { %1161 = vmatprep.subr.mxu1 %v1651_v56  ;;  %1048 = vmatpush2.msra.mxu0 %v1756_v52  ;;  %v1750_v56 = vld [vmem:[%s3326_s3 + $0xb10] sm:$0xff]  ;;  %v1791_v50 = vld [vmem:[%s3326_s3 + $0xc58] sm:$0x1] }
 0x18e   :  { %1162 = vmatpush1.msra.mxu1 %v1650_v58  ;;  %1049 = vmatprep.subr.mxu0 %v1751_v54  ;;  %v1745_v58 = vld [vmem:[%s3326_s3 + $0xae8] sm:$0xff] }
 0x18f   :  { %1163 = vmatprep.subr.mxu1 %v1645_v60  ;;  %1050 = vmatpush2.msra.mxu0 %v1750_v56  ;;  %v1744_v60 = vld [vmem:[%s3326_s3 + $0xae0] sm:$0xff] }
 0x190   :  { %1164 = vmatpush1.msra.mxu1 %v1644_v62  ;;  %1051 = vmatprep.subr.mxu0 %v1745_v58  ;;  %v1746_v62 = vld [vmem:[%s3326_s3 + $0xaf0] sm:$0xff] }
 0x191   :  { %1165 = vmatprep.subr.mxu1 %v1639_v0  ;;  %1052 = vmatpush2.msra.mxu0 %v1744_v60  ;;  %v1741_v0 = vld [vmem:[%s3326_s3 + $0xac8] sm:$0xff] }
 0x192   :  { %1166 = vmatpush1.msra.mxu1 %v1638_v2  ;;  %1053 = vmatprep.subr.mxu0 %v1739_v61  ;;  %v1740_v2 = vld [vmem:[%s3326_s3 + $0xac0] sm:$0xff] }
 0x193   :  { %1167 = vmatprep.subr.mxu1 %v1633_v5  ;;  %v1735_v5 = vld [vmem:[%s3326_s3 + $0xa98] sm:$0xff]  ;;  %1054 = vmatpush2.msra.mxu0 %v1738_v63 }
 0x194   :  { %1168 = vmatpush1.msra.mxu1 %v1632_v7  ;;  %v1734_v7 = vld [vmem:[%s3326_s3 + $0xa90] sm:$0xff]  ;;  %1055 = vmatprep.subr.mxu0 %v1733_v1 }
 0x195   :  { %1169 = vmatprep.subr.mxu1 %v1627_v9  ;;  %v1729_v9 = vld [vmem:[%s3326_s3 + $0xa68] sm:$0xff]  ;;  %1056 = vmatpush2.msra.mxu0 %v1732_v4 }
 0x196   :  { %1170 = vmatpush1.msra.mxu1 %v1626_v11  ;;  %v1721_v11 = vld [vmem:[%s3326_s3 + $0xa28] sm:$0xff]  ;;  %1057 = vmatprep.subr.mxu0 %v1727_v6 }
 0x197   :  { %1171 = vmatprep.subr.mxu1 %v1621_v13  ;;  %v1720_v13 = vld [vmem:[%s3326_s3 + $0xa20] sm:$0xff]  ;;  %1058 = vmatpush2.msra.mxu0 %v1726_v8 }
 0x198   :  { %1172 = vmatpush1.msra.mxu1 %v1620_v15  ;;  %v1715_v15 = vld [vmem:[%s3326_s3 + $0x9f8] sm:$0xff]  ;;  %1059 = vmatprep.subr.mxu0 %v1721_v11 }
 0x199   :  { %1173 = vmatprep.subr.mxu1 %v1615_v17  ;;  %v1714_v17 = vld [vmem:[%s3326_s3 + $0x9f0] sm:$0xff]  ;;  %1060 = vmatpush2.msra.mxu0 %v1720_v13 }
 0x19a   :  { %1174 = vmatpush1.msra.mxu1 %v1614_v20  ;;  %v1709_v20 = vld [vmem:[%s3326_s3 + $0x9c8] sm:$0xff]  ;;  %1061 = vmatprep.subr.mxu0 %v1715_v15  ;;  %v1786_v13 = vld [vmem:[%s3326_s3 + $0xc30] sm:$0x1] }
 0x19b   :  { %1175 = vmatprep.subr.mxu1 %v1609_v23  ;;  %v1708_v23 = vld [vmem:[%s3326_s3 + $0x9c0] sm:$0xff]  ;;  %1062 = vmatpush2.msra.mxu0 %v1714_v17  ;;  %v1790_v15 = vld [vmem:[%s3326_s3 + $0xc50] sm:$0x1] }
 0x19c   :  { %1176 = vmatpush1.msra.mxu1 %v1608_v25  ;;  %v1703_v25 = vld [vmem:[%s3326_s3 + $0x998] sm:$0xff]  ;;  %1063 = vmatprep.subr.mxu0 %v1709_v20  ;;  %v1688_v17 = vld [vmem:[%s3326_s3 + $0x920] sm:$0xff]  ;;  %v1682_v20 = vld [vmem:[%s3326_s3 + $0x8f0] sm:$0xff] }
 0x19d   :  { %1177 = vmatprep.subr.mxu1 %v1603_v28  ;;  %v1702_v28 = vld [vmem:[%s3326_s3 + $0x990] sm:$0xff]  ;;  %1064 = vmatpush2.msra.mxu0 %v1708_v23  ;;  %v1676_v23 = vld [vmem:[%s3326_s3 + $0x8c0] sm:$0xff] }
 0x19e   :  { %1178 = vmatpush1.msra.mxu1 %v1602_v30  ;;  %v1697_v30 = vld [vmem:[%s3326_s3 + $0x968] sm:$0xff]  ;;  %1065 = vmatprep.subr.mxu0 %v1703_v25 }
 0x19f   :  { %1179 = vmatprep.subr.mxu1 %v1597_v32  ;;  %v1696_v32 = vld [vmem:[%s3326_s3 + $0x960] sm:$0xff]  ;;  %1066 = vmatpush2.msra.mxu0 %v1702_v28  ;;  %v1665_v25 = vld [vmem:[%s3326_s3 + $0x868] sm:$0xff]  ;;  %v1659_v28 = vld [vmem:[%s3326_s3 + $0x838] sm:$0xff] }
 0x1a0   :  { %1180 = vmatpush1.msra.mxu1 %v1596_v34  ;;  %v1691_v34 = vld [vmem:[%s3326_s3 + $0x938] sm:$0xff]  ;;  %1067 = vmatprep.subr.mxu0 %v1697_v30  ;;  %v1653_v30 = vld [vmem:[%s3326_s3 + $0x808] sm:$0xff] }
 0x1a1   :  { %1181 = vmatprep.subr.mxu1 %v1783_v26  ;;  %v1690_v26 = vld [vmem:[%s3326_s3 + $0x930] sm:$0xff]  ;;  %1068 = vmatpush2.msra.mxu0 %v1696_v32  ;;  %v1647_v32 = vld [vmem:[%s3326_s3 + $0x7d8] sm:$0xff] }
 0x1a2   :  { %1182 = vmatpush2.msra.mxu1 %v1782_v37  ;;  %v1787_v37 = vld [vmem:[%s3326_s3 + $0xc38] sm:$0x1]  ;;  %1069 = vmatprep.subr.mxu0 %v1691_v34  ;;  %v1641_v34 = vld [vmem:[%s3326_s3 + $0x7a8] sm:$0xff] }
 0x1a3   :  { %1183 = vmatprep.subr.mxu1 %v1777_v39  ;;  %1070 = vmatpush2.msra.mxu0 %v1690_v26  ;;  %v476_v39 = vpop.f32.mrf.mxu0  ;;  %v1635_v26 = vld [vmem:[%s3326_s3 + $0x778] sm:$0xff] }
 0x1a4   :  { %1184 = vmatpush2.msra.mxu1 %v1776_v41  ;;  %1792 = vmatprep.mubr.msk.f32.mxu0 %vm116_vm5, %v2998_v36 }
 0x1a5   :  { %1185 = vmatprep.subr.mxu1 %v1771_v43  ;;  %1793 = vmatprep.subr.msk.mxu0 %vm320_vm1, %v1787_v37  ;;  %v478_v40 = vpop.f32.mrf.mxu0  ;;  %v1634_v37 = vld [vmem:[%s3326_s3 + $0x770] sm:$0xff] }
 0x1a6   :  { %1186 = vmatpush2.msra.mxu1 %v1770_v45  ;;  %1796 = vmatprep.mubr.msk.f32.mxu1 %vm116_vm5, %v2998_v36 }
 0x1a7   :  { %1187 = vmatprep.subr.mxu1 %v1765_v47 }
 0x1a8   :  { %1188 = vmatpush2.msra.mxu1 %v1764_v49 }
 0x1a9   :  { %1189 = vmatprep.subr.mxu1 %v1759_v51 }
 0x1aa   :  { %1190 = vmatpush2.msra.mxu1 %v1758_v53 }
 0x1ab   :  { %1191 = vmatprep.subr.mxu1 %v1753_v55 }
 0x1ac   :  { %1192 = vmatpush2.msra.mxu1 %v1752_v57 }
 0x1ad   :  { %1193 = vmatprep.subr.mxu1 %v1747_v59 }
 0x1ae   :  { %1194 = vmatpush2.msra.mxu1 %v1746_v62 }
 0x1af   :  { %1195 = vmatprep.subr.mxu1 %v1741_v0 }
 0x1b0   :  { %1196 = vmatpush2.msra.mxu1 %v1740_v2 }
 0x1b1   :  { %1197 = vmatprep.subr.mxu1 %v1735_v5 }
 0x1b2   :  { %1198 = vmatpush2.msra.mxu1 %v1734_v7  ;;  %v117_v7 = vsel %vm116_vm5, %v2384_v19, 0.0  ;;  %v1788_v19 = vld [vmem:[%s3326_s3 + $0xc40] sm:$0x1] }
 0x1b3   :  { %1199 = vmatprep.subr.mxu1 %v1729_v9 }
 0x1b4   :  { %1200 = vmatpush2.msra.mxu1 %v1728_v10 }
 0x1b5   :  { %1201 = vmatprep.subr.mxu1 %v1723_v12 }
 0x1b6   :  { %1202 = vmatpush2.msra.mxu1 %v1722_v14  ;;  %v1789_v14 = vld [vmem:[%s3326_s3 + $0xc48] sm:$0x1] }
 0x1b7   :  { %1203 = vmatprep.subr.mxu1 %v1717_v16  ;;  %v1689_v16 = vld [vmem:[%s3326_s3 + $0x928] sm:$0xff] }
 0x1b8   :  { %1204 = vmatpush2.msra.mxu1 %v1716_v18  ;;  %v1683_v18 = vld [vmem:[%s3326_s3 + $0x8f8] sm:$0xff] }
 0x1b9   :  { %1205 = vmatprep.subr.mxu1 %v1711_v22  ;;  %v1677_v22 = vld [vmem:[%s3326_s3 + $0x8c8] sm:$0xff] }
 0x1ba   :  { %1206 = vmatpush2.msra.mxu1 %v1710_v24  ;;  %v1670_v24 = vld [vmem:[%s3326_s3 + $0x890] sm:$0xff] }
 0x1bb   :  { %1207 = vmatprep.subr.mxu1 %v1705_v27  ;;  %v1664_v27 = vld [vmem:[%s3326_s3 + $0x860] sm:$0xff] }
 0x1bc   :  { %1208 = vmatpush2.msra.mxu1 %v1704_v29  ;;  %v1658_v29 = vld [vmem:[%s3326_s3 + $0x830] sm:$0xff] }
 0x1bd   :  { %1209 = vmatprep.subr.mxu1 %v1699_v31  ;;  %v1652_v31 = vld [vmem:[%s3326_s3 + $0x800] sm:$0xff] }
 0x1be   :  { %1210 = vmatpush2.msra.mxu1 %v1698_v33  ;;  %v1646_v33 = vld [vmem:[%s3326_s3 + $0x7d0] sm:$0xff] }
 0x1bf   :  { %1211 = vmatprep.subr.mxu1 %v1693_v35  ;;  %v1640_v35 = vld [vmem:[%s3326_s3 + $0x7a0] sm:$0xff] }
 0x1c0   :  { %1212 = vmatpush2.msra.mxu1 %v1692_v38  ;;  %v1629_v38 = vld [vmem:[%s3326_s3 + $0x748] sm:$0xff] }
 0x1c1   :  { %1801 = vmatprep.subr.msk.mxu1 %vm320_vm1, %v1791_v50  ;;  %v1785_v50 = vld [vmem:[%s3326_s3 + $0xc28] sm:$0xff] }
 0x201   :  { %v547_v41 = vpop.f32.mrf.mxu0  ;;  %v405_v45 = vpop.f32.mrf.mxu1 }
 0x202   :  { %v477_v47 = vadd.f32 %v476_v39, %v405_v45  ;;  %v1628_v39 = vld [vmem:[%s3326_s3 + $0x740] sm:$0xff]  ;;  %v1610_v45 = vld [vmem:[%s3326_s3 + $0x6b0] sm:$0xff] }
 0x203   :  { %v549_v42 = vpop.f32.mrf.mxu0  ;;  %v407_v52 = vpop.f32.mrf.mxu1 }
 0x204   :  { %v479_v56 = vadd.f32 %v478_v40, %v407_v52  ;;  %v1623_v40 = vld [vmem:[%s3326_s3 + $0x718] sm:$0xff] }
 0x205   :  { %v618_v43 = vpop.f32.mrf.mxu0  ;;  %v1779_v52 = vld [vmem:[%s3326_s3 + $0xbf8] sm:$0xff] }
 0x206   :  { %v619_v1 = vadd.f32 %v618_v43, %v547_v41  ;;  %v1622_v41 = vld [vmem:[%s3326_s3 + $0x710] sm:$0xff]  ;;  %v1616_v43 = vld [vmem:[%s3326_s3 + $0x6e0] sm:$0xff] }
 0x207   :  { %v620_v44 = vpop.f32.mrf.mxu0 }
 0x208   :  { %v621_v46 = vadd.f32 %v620_v44, %v549_v42  ;;  %v1617_v42 = vld [vmem:[%s3326_s3 + $0x6e8] sm:$0xff]  ;;  %v1611_v44 = vld [vmem:[%s3326_s3 + $0x6b8] sm:$0xff] }
 0x209   :  { %v760_v54 = vpop.f32.mrf.mxu0 }
 0x20a   :  { %v765_v48 = vadd.f32 %v621_v46, %v477_v47  ;;  %v1605_v46 = vld [vmem:[%s3326_s3 + $0x688] sm:$0xff]  ;;  %v1604_v47 = vld [vmem:[%s3326_s3 + $0x680] sm:$0xff] }
 0x20b   :  { %v762_v61 = vpop.f32.mrf.mxu0 }
 0x20c   :  { %v1591_v49 = vmul.f32 -1.442695, %v765_v48  ;;  %v1599_v48 = vld [vmem:[%s3326_s3 + $0x658] sm:$0xff] }
 0x20e   :  { %1845 = vpow2.f32 %v1591_v49  ;;  %v1598_v49 = vld [vmem:[%s3326_s3 + $0x650] sm:$0xff] }
 0x21b   :  { %v1846_v51 = vpop.eup %1845 }
 0x21c   :  { %v769_v53 = vadd.f32 1.0, %v1846_v51  ;;  %v1784_v51 = vld [vmem:[%s3326_s3 + $0xc20] sm:$0xff] }
 0x21e   :  { %1847 = vrcp.f32 %v769_v53  ;;  %v1778_v53 = vld [vmem:[%s3326_s3 + $0xbf0] sm:$0xff] }
 0x22b   :  { %v1848_v63 = vpop.eup %1847 }
 0x241   :  { %v689_v55 = vpop.f32.mrf.mxu1 }
 0x242   :  { %v761_v57 = vadd.f32 %v760_v54, %v689_v55  ;;  %v1773_v54 = vld [vmem:[%s3326_s3 + $0xbc8] sm:$0xff]  ;;  %v1772_v55 = vld [vmem:[%s3326_s3 + $0xbc0] sm:$0xff] }
 0x243   :  { %v691_v60 = vpop.f32.mrf.mxu1 }
 0x244   :  { %v772_v58 = vadd.f32 %v761_v57, %v479_v56  ;;  %v763_v62 = vadd.f32 %v762_v61, %v691_v60  ;;  %v1767_v56 = vld [vmem:[%s3326_s3 + $0xb98] sm:$0xff]  ;;  %v1766_v57 = vld [vmem:[%s3326_s3 + $0xb90] sm:$0xff] }
 0x245   :  { %v1755_v60 = vld [vmem:[%s3326_s3 + $0xb38] sm:$0xff]  ;;  %v1754_v61 = vld [vmem:[%s3326_s3 + $0xb30] sm:$0xff] }
 0x246   :  { %v1592_v59 = vmul.f32 -1.442695, %v772_v58  ;;  %v779_v0 = vmul.f32 %v1848_v63, %v763_v62  ;;  %v1761_v58 = vld [vmem:[%s3326_s3 + $0xb68] sm:$0xff]  ;;  %v1748_v63 = vld [vmem:[%s3326_s3 + $0xb00] sm:$0xff] }
 0x247   :  { %v1749_v62 = vld [vmem:[%s3326_s3 + $0xb08] sm:$0xff] }
 0x248   :  { %1849 = vpow2.f32 %v1592_v59  ;;  %v780_v5 = vadd.f32 %v779_v0, %v619_v1  ;;  %v1760_v59 = vld [vmem:[%s3326_s3 + $0xb60] sm:$0xff]  ;;  %v1743_v0 = vld [vmem:[%s3326_s3 + $0xad8] sm:$0xff]  ;;  %v1742_v1 = vld [vmem:[%s3326_s3 + $0xad0] sm:$0xff] }
 0x255   :  { %v1850_v2 = vpop.eup %1849 }
 0x256   :  { %v776_v4 = vadd.f32 1.0, %v1850_v2  ;;  %v1737_v2 = vld [vmem:[%s3326_s3 + $0xaa8] sm:$0xff] }
 0x258   :  { %1851 = vrcp.f32 %v776_v4  ;;  %v1736_v4 = vld [vmem:[%s3326_s3 + $0xaa0] sm:$0xff] }
 0x259   :  { %1853 = vtanh.f32 %v780_v5  ;;  %v1731_v5 = vld [vmem:[%s3326_s3 + $0xa78] sm:$0xff] }
 0x265   :  { %v1852_v6 = vpop.eup %1851 }
 0x266   :  { %v782_v8 = vsub.f32 1.0, %v1852_v6  ;;  %v1854_v9 = vpop.eup %1853  ;;  %v784_v11 = vmul.f32 %v1852_v6, %v117_v7  ;;  %v1730_v6 = vld [vmem:[%s3326_s3 + $0xa70] sm:$0xff]  ;;  %v1725_v7 = vld [vmem:[%s3326_s3 + $0xa48] sm:$0xff] }
 0x268   :  { %v783_v10 = vmul.f32 %v1854_v9, %v782_v8  ;;  %v1724_v8 = vld [vmem:[%s3326_s3 + $0xa40] sm:$0xff]  ;;  %v1719_v9 = vld [vmem:[%s3326_s3 + $0xa18] sm:$0xff] }
 0x26a   :  { %v3017_v12 = vadd.f32 %v784_v11, %v783_v10  ;;  %v1718_v10 = vld [vmem:[%s3326_s3 + $0xa10] sm:$0xff]  ;;  %v1713_v11 = vld [vmem:[%s3326_s3 + $0x9e8] sm:$0xff] }
 0x26c   :  { %1072 = vmatmul.mubr.f32.vlgmr.msra.gmra.mxu0 %v3017_v12  ;;  %786 = vst.msk [vmem:[#allocation4] sm:$0xff] %vm116_vm5, %v3017_v12  ;;  %1214 = vmatmul.mubr.f32.vlgmr.msra.gmra.mxu1 %v3017_v12 }
 0x26d   :  { %1794 = vmatpush1.msk.msra.mxu0 %vm320_vm1, %v1786_v13  ;;  %1142 = vmatprep.mubr.f32.mxu0 %v1910_v3  ;;  %v1712_v13 = vld [vmem:[%s3326_s3 + $0x9e0] sm:$0xff] }
 0x26e   :  { %1797 = vmatprep.subr.msk.mxu0 %vm320_vm1, %v1789_v14  ;;  %1802 = vmatpush1.msk.msra.mxu1 %vm320_vm1, %v1790_v15  ;;  %v1707_v14 = vld [vmem:[%s3326_s3 + $0x9b8] sm:$0xff]  ;;  %v1706_v15 = vld [vmem:[%s3326_s3 + $0x9b0] sm:$0xff] }
 0x26f   :  { %1426 = vmatprep.mubr.f32.mxu1 %v1910_v3  ;;  %1476 = vmatprep.subr.mxu1 %v1910_v3 }
 0x270   :  { %1795 = vmatmul.mubr.msk.f32.vlgmr.msra.gmra.mxu0 %vm316_vm4, %v1912_v21  ;;  %1803 = vmatmul.mubr.msk.f32.vlgmr.msra.gmra.mxu1 %vm316_vm4, %v1912_v21 }
 0x271   :  { %1798 = vmatpush1.msk.msra.mxu0 %vm320_vm1, %v1788_v19  ;;  %1284 = vmatprep.mubr.f32.mxu0 %v1910_v3  ;;  %v1701_v19 = vld [vmem:[%s3326_s3 + $0x988] sm:$0xff] }
 0x272   :  { %1291 = vmatprep.subr.mxu0 %v1689_v16  ;;  %1807 = vmatprep.mubr.msk.f32.mxu1 %vm316_vm4, %v1912_v21  ;;  %v1700_v16 = vld [vmem:[%s3326_s3 + $0x980] sm:$0xff] }
 0x274   :  { %1799 = vmatmul.mubr.msk.f32.vlgmr.msra.gmra.mxu0 %vm316_vm4, %v1912_v21  ;;  %v1671_v21 = vld [vmem:[%s3326_s3 + $0x898] sm:$0xff] }
 0x275   :  { %1292 = vmatpush1.msra.mxu0 %v1688_v17  ;;  %1800 = vmatprep.mubr.msk.f32.mxu0 %vm116_vm5, %v2998_v36  ;;  %v1695_v17 = vld [vmem:[%s3326_s3 + $0x958] sm:$0xff] }
 0x276   :  { %1293 = vmatprep.subr.mxu0 %v1683_v18  ;;  %v1694_v18 = vld [vmem:[%s3326_s3 + $0x950] sm:$0xff] }
 0x277   :  { %1294 = vmatpush1.msra.mxu0 %v1682_v20  ;;  %v1471_v20 = vld [vmem:[%s3327_s4 + $0x78] sm:$0xff] }
 0x278   :  { %1295 = vmatprep.subr.mxu0 %v1677_v22  ;;  %1477 = vmatpush1.msra.mxu1 %v1471_v20  ;;  %v1470_v22 = vld [vmem:[%s3327_s4 + $0x70] sm:$0xff] }
 0x279   :  { %1296 = vmatpush1.msra.mxu0 %v1676_v23  ;;  %1478 = vmatprep.subr.mxu1 %v1910_v3  ;;  %v1469_v23 = vld [vmem:[%s3327_s4 + $0x68] sm:$0xff] }
 0x27a   :  { %1297 = vmatprep.subr.mxu0 %v1671_v21  ;;  %1479 = vmatpush1.msra.mxu1 %v1470_v22  ;;  %v1467_v21 = vld [vmem:[%s3327_s4 + $0x58] sm:$0xff] }
 0x27b   :  { %1298 = vmatpush1.msra.mxu0 %v1670_v24  ;;  %1480 = vmatprep.subr.mxu1 %v1910_v3  ;;  %v1466_v24 = vld [vmem:[%s3327_s4 + $0x50] sm:$0xff] }
 0x27c   :  { %1299 = vmatprep.subr.mxu0 %v1665_v25  ;;  %1481 = vmatpush1.msra.mxu1 %v1469_v23  ;;  %v1465_v25 = vld [vmem:[%s3327_s4 + $0x48] sm:$0xff] }
 0x27d   :  { %1300 = vmatpush1.msra.mxu0 %v1664_v27  ;;  %1482 = vmatprep.subr.mxu1 %v1910_v3  ;;  %v1464_v27 = vld [vmem:[%s3327_s4 + $0x40] sm:$0xff] }
 0x27e   :  { %1301 = vmatprep.subr.mxu0 %v1659_v28  ;;  %v1463_v28 = vld [vmem:[%s3327_s4 + $0x38] sm:$0xff] }
 0x27f   :  { %1302 = vmatpush1.msra.mxu0 %v1658_v29  ;;  %v1462_v29 = vld [vmem:[%s3327_s4 + $0x30] sm:$0xff] }
 0x280   :  { %1303 = vmatprep.subr.mxu0 %v1653_v30  ;;  %v1461_v30 = vld [vmem:[%s3327_s4 + $0x28] sm:$0xff] }
 0x281   :  { %1304 = vmatpush1.msra.mxu0 %v1652_v31  ;;  %v1460_v31 = vld [vmem:[%s3327_s4 + $0x20] sm:$0xff] }
 0x282   :  { %1305 = vmatprep.subr.mxu0 %v1647_v32  ;;  %v1459_v32 = vld [vmem:[%s3327_s4 + $0x18] sm:$0xff] }
 0x283   :  { %1306 = vmatpush1.msra.mxu0 %v1646_v33  ;;  %v1458_v33 = vld [vmem:[%s3327_s4 + $0x10] sm:$0xff] }
 0x284   :  { %1307 = vmatprep.subr.mxu0 %v1641_v34  ;;  %v1457_v34 = vld [vmem:[%s3327_s4 + $0x8] sm:$0xff] }
 0x285   :  { %1308 = vmatpush1.msra.mxu0 %v1640_v35  ;;  %v1456_v35 = vld [vmem:[%s3327_s4] sm:$0xff] }
 0x286   :  { %1309 = vmatprep.subr.mxu0 %v1635_v26  ;;  %v1472_v26 = vld [vmem:[%s3327_s4 + $0x80] sm:$0x1] }
 0x287   :  { %1310 = vmatpush1.msra.mxu0 %v1634_v37 }
 0x288   :  { %1311 = vmatprep.subr.mxu0 %v1629_v38 }
 0x289   :  { %1312 = vmatpush1.msra.mxu0 %v1628_v39 }
 0x28a   :  { %1313 = vmatprep.subr.mxu0 %v1623_v40 }
 0x28b   :  { %1314 = vmatpush1.msra.mxu0 %v1622_v41 }
 0x28c   :  { %1315 = vmatprep.subr.mxu0 %v1617_v42 }
 0x28d   :  { %1316 = vmatpush1.msra.mxu0 %v1616_v43 }
 0x28e   :  { %1317 = vmatprep.subr.mxu0 %v1611_v44 }
 0x28f   :  { %1318 = vmatpush1.msra.mxu0 %v1610_v45 }
 0x290   :  { %1319 = vmatprep.subr.mxu0 %v1605_v46 }
 0x291   :  { %1320 = vmatpush1.msra.mxu0 %v1604_v47 }
 0x292   :  { %1321 = vmatprep.subr.mxu0 %v1599_v48 }
 0x293   :  { %1322 = vmatpush1.msra.mxu0 %v1598_v49 }
 0x294   :  { %1323 = vmatprep.subr.mxu0 %v1785_v50 }
 0x295   :  { %1324 = vmatpush2.msra.mxu0 %v1784_v51 }
 0x296   :  { %1325 = vmatprep.subr.mxu0 %v1779_v52 }
 0x297   :  { %1326 = vmatpush2.msra.mxu0 %v1778_v53 }
 0x298   :  { %1327 = vmatprep.subr.mxu0 %v1773_v54 }
 0x299   :  { %1328 = vmatpush2.msra.mxu0 %v1772_v55 }
 0x29a   :  { %1329 = vmatprep.subr.mxu0 %v1767_v56 }
 0x29b   :  { %1330 = vmatpush2.msra.mxu0 %v1766_v57 }
 0x29c   :  { %1331 = vmatprep.subr.mxu0 %v1761_v58 }
 0x29d   :  { %1332 = vmatpush2.msra.mxu0 %v1760_v59 }
 0x29e   :  { %1333 = vmatprep.subr.mxu0 %v1755_v60 }
 0x29f   :  { %1334 = vmatpush2.msra.mxu0 %v1754_v61 }
 0x2a0   :  { %1335 = vmatprep.subr.mxu0 %v1749_v62 }
 0x2a1   :  { %1336 = vmatpush2.msra.mxu0 %v1748_v63 }
 0x2a2   :  { %1337 = vmatprep.subr.mxu0 %v1743_v0 }
 0x2a3   :  { %1338 = vmatpush2.msra.mxu0 %v1742_v1 }
 0x2a4   :  { %1339 = vmatprep.subr.mxu0 %v1737_v2  ;;  %v789_v2 = vsel %vm116_vm5, %v2998_v36, 0.0 }
 0x2a5   :  { %1340 = vmatpush2.msra.mxu0 %v1736_v4 }
 0x2a6   :  { %1341 = vmatprep.subr.mxu0 %v1731_v5 }
 0x2a7   :  { %1342 = vmatpush2.msra.mxu0 %v1730_v6 }
 0x2a8   :  { %1343 = vmatprep.subr.mxu0 %v1725_v7 }
 0x2a9   :  { %1344 = vmatpush2.msra.mxu0 %v1724_v8 }
 0x2aa   :  { %1345 = vmatprep.subr.mxu0 %v1719_v9 }
 0x2ab   :  { %1346 = vmatpush2.msra.mxu0 %v1718_v10 }
 0x2ac   :  { %1347 = vmatprep.subr.mxu0 %v1713_v11 }
 0x2ad   :  { %1348 = vmatpush2.msra.mxu0 %v1712_v13 }
 0x2ae   :  { %1349 = vmatprep.subr.mxu0 %v1707_v14 }
 0x2af   :  { %1350 = vmatpush2.msra.mxu0 %v1706_v15 }
 0x2b0   :  { %1351 = vmatprep.subr.mxu0 %v1701_v19 }
 0x2b1   :  { %1352 = vmatpush2.msra.mxu0 %v1700_v16 }
 0x2b2   :  { %1353 = vmatprep.subr.mxu0 %v1695_v17 }
 0x2b3   :  { %1354 = vmatpush2.msra.mxu0 %v1694_v18 }
 0x2b4   :  { %1356 = vmatmul.mubr.f32.vlgmr.msra.gmra.mxu0 %v3017_v12  ;;  %v1468_v12 = vld [vmem:[%s3327_s4 + $0x60] sm:$0xff]  ;;  %s1913_s4 = smov [#allocation4]  }
 0x2b5   :  { %1483 = vmatpush1.msra.mxu1 %v1468_v12  ;;  %s1562_s0 = sshll.u32 %s1913_s4, 4  ;;  %s1563_s0 = int_to_ptr.vmem [resolvable:$true] %s1562_s0 }
 0x2b6   :  { %1484 = vmatprep.subr.mxu1 %v1910_v3  ;;  %s1865_s29 = scalar_lea.vmem %s1563_s0, 256  ;;  %p1870_p1 = scmp.lt.s32.totalorder %s1563_s0, %s1563_s0 }
 0x2b7   :  { %1485 = vmatpush1.msra.mxu1 %v1467_v21  ;;  %p1866_p0 = scmp.ne.s32.totalorder %s1563_s0, %s1865_s29  ;;  %p1871_p2 = scmp.lt.s32.totalorder %s1865_s29, %s1865_s29 }
 0x2b8   :  { %1486 = vmatprep.subr.mxu1 %v1910_v3 }
 0x2b9   :  { %1487 = vmatpush1.msra.mxu1 %v1466_v24  ;;  %p1872_p3 = por %p1871_p2, %p1870_p1 }
 0x2ba   :  { %1488 = vmatprep.subr.mxu1 %v1910_v3 }
 0x2bb   :  { %1489 = vmatpush1.msra.mxu1 %v1465_v25  ;;  %p1873_p4 = pnand %p1872_p3, %p1866_p0 }
 0x2bc   :  { %1490 = vmatprep.subr.mxu1 %v1910_v3 }
 0x2bd   :  { %1491 = vmatpush1.msra.mxu1 %v1464_v27 }
 0x2be   :  { %1492 = vmatprep.subr.mxu1 %v1910_v3 }
 0x2bf   :  { %1493 = vmatpush1.msra.mxu1 %v1463_v28 }
 0x2c0   :  { %1494 = vmatprep.subr.mxu1 %v1910_v3 }
 0x2c1   :  { %1495 = vmatpush1.msra.mxu1 %v1462_v29 }
 0x2c2   :  { %1496 = vmatprep.subr.mxu1 %v1910_v3 }
 0x2c3   :  { %1497 = vmatpush1.msra.mxu1 %v1461_v30 }
 0x2c4   :  { %1498 = vmatprep.subr.mxu1 %v1910_v3 }
 0x2c5   :  { %1499 = vmatpush1.msra.mxu1 %v1460_v31 }
 0x2c6   :  { %1500 = vmatprep.subr.mxu1 %v1910_v3 }
 0x2c7   :  { %1501 = vmatpush1.msra.mxu1 %v1459_v32 }
 0x2c8   :  { %1502 = vmatprep.subr.mxu1 %v1910_v3 }
 0x2c9   :  { %1503 = vmatpush1.msra.mxu1 %v1458_v33 }
 0x2ca   :  { %1504 = vmatprep.subr.mxu1 %v1910_v3 }
 0x2cb   :  { %1505 = vmatpush1.msra.mxu1 %v1457_v34 }
 0x2cc   :  { %1506 = vmatprep.subr.mxu1 %v1910_v3 }
 0x2cd   :  { %1507 = vmatpush1.msra.mxu1 %v1456_v35 }
 0x2ce   :  { %1538 = vmatprep.subr.mxu1 %v1910_v3 }
 0x2cf   :  { %1806 = vmatpush2.msk.msra.mxu1 %vm320_vm1, %v1472_v26 }
 0x32c   :  { %v1073_v37 = vpop.f32.mrf.mxu0  ;;  %v1215_v42 = vpop.f32.mrf.mxu1 }
 0x32e   :  { %v1075_v38 = vpop.f32.mrf.mxu0  ;;  %v1217_v44 = vpop.f32.mrf.mxu1 }
 0x330   :  { %v1144_v39 = vpop.f32.mrf.mxu0  ;;  %v1428_v51 = vpop.f32.mrf.mxu1 }
 0x331   :  { %v1145_v46 = vadd.f32 %v1144_v39, %v1073_v37 }
 0x332   :  { %v1146_v40 = vpop.f32.mrf.mxu0  ;;  %v1430_v57 = vpop.f32.mrf.mxu1 }
 0x333   :  { %v1147_v3 = vadd.f32 %v1146_v40, %v1075_v38 }
 0x334   :  { %v1286_v41 = vpop.f32.mrf.mxu0 }
 0x335   :  { %v1287_v61 = vadd.f32 %v1286_v41, %v1215_v42 }
 0x336   :  { %v1288_v43 = vpop.f32.mrf.mxu0 }
 0x337   :  { %v1289_v45 = vadd.f32 %v1288_v43, %v1217_v44 }
 0x339   :  { %v1433_v47 = vadd.f32 %v1289_v45, %v1145_v46 }
 0x33b   :  { %v1804_v48 = vmul.f32 -1.442695, %v1433_v47 }
 0x33d   :  { %1855 = vpow2.f32 %v1804_v48 }
 0x34a   :  { %v1856_v49 = vpop.eup %1855 }
 0x34b   :  { %v1437_v50 = vadd.f32 1.0, %v1856_v49 }
 0x34d   :  { %1857 = vrcp.f32 %v1437_v50 }
 0x35a   :  { %v1858_v59 = vpop.eup %1857 }
 0x374   :  { %v1357_v52 = vpop.f32.mrf.mxu0 }
 0x375   :  { %v1429_v53 = vadd.f32 %v1428_v51, %v1357_v52 }
 0x376   :  { %v1359_v56 = vpop.f32.mrf.mxu0 }
 0x377   :  { %v1440_v54 = vadd.f32 %v1429_v53, %v1147_v3  ;;  %v1431_v58 = vadd.f32 %v1430_v57, %v1359_v56 }
 0x379   :  { %v1805_v55 = vmul.f32 -1.442695, %v1440_v54  ;;  %v1447_v60 = vmul.f32 %v1858_v59, %v1431_v58 }
 0x37b   :  { %1859 = vpow2.f32 %v1805_v55  ;;  %v1448_v0 = vadd.f32 %v1447_v60, %v1287_v61 }
 0x388   :  { %v1860_v62 = vpop.eup %1859 }
 0x389   :  { %v1444_v63 = vadd.f32 1.0, %v1860_v62 }
 0x38b   :  { %1861 = vrcp.f32 %v1444_v63 }
 0x38c   :  { %1863 = vtanh.f32 %v1448_v0 }
 0x398   :  { %v1862_v1 = vpop.eup %1861 }
 0x399   :  { %v1450_v4 = vsub.f32 1.0, %v1862_v1  ;;  %v1864_v5 = vpop.eup %1863  ;;  %v1452_v7 = vmul.f32 %v1862_v1, %v789_v2 }
 0x39b   :  { %v1451_v6 = vmul.f32 %v1864_v5, %v1450_v4 }
 0x39d   :  { %v1453_v8 = vadd.f32 %v1452_v7, %v1451_v6 }
 0x39f   :  { %1541 = vmatmul.mubr.f32.vlgmr.msra.gmra.mxu1 %v1453_v8  ;;  %1455 = vst.msk [vmem:[#allocation4 + $0x8] sm:$0xff] %vm116_vm5, %v1453_v8 }
 0x3a0   :  { %1876 = shalt.err (!%p1873_p4)
}
 0x3a1   :  { %s1914_s30 = smov 128   ;;  %s1915_s7 = smov 8  }
 0x3a2   :  { %1568 = dma.vmem_to_hbm [thread:$0]  %s1563_s0, 256, %s3329_s6, [#allocation5], %s1914_s30, %s1914_s30, %s1915_s7  }
 0x3a3   :  { %s1916_s10 = smov [#allocation2]  }
 0x3a4   :  { %s1553_s11 = sshll.u32 %s1916_s10, 4  ;;  %s1554_s11 = int_to_ptr.vmem [resolvable:$true] %s1553_s11 }
 0x3a5   :  { %s1885_s12 = scalar_lea.vmem %s1554_s11, 128  ;;  %p1890_p6 = scmp.lt.s32.totalorder %s1554_s11, %s1554_s11 }
 0x3a6   :  { %p1886_p5 = scmp.ne.s32.totalorder %s1554_s11, %s1885_s12  ;;  %p1891_p7 = scmp.lt.s32.totalorder %s1885_s12, %s1885_s12 }
 0x3a8   :  { %p1892_p8 = por %p1891_p7, %p1890_p6 }
 0x3aa   :  { %p1893_p9 = pnand %p1892_p8, %p1886_p5 }
 0x45f   :  { %v1542_v36 = vpop.f32.mrf.mxu1 }
 0x460   :  { %1546 = vst [vmem:[#allocation2] sm:$0xff] %v1542_v36 }
 0x461   :  { %v1544_v9 = vpop.f32.mrf.mxu1 }
 0x462   :  { %1896 = shalt.err (!%p1893_p9)
}
 0x463   :  { %1556 = dma.vmem_to_hbm [thread:$0]  %s1554_s11, 128, %s3328_s5, [#allocation3]  }
 0x464   :  { %1905 = dma.done.wait [#allocation3], 128  }
 0x465   :  { %1906 = vsyncadd [#allocation3], 4294967168 }
 0x466   :  { %1907 = dma.done.wait [#allocation5], 256  }
 0x467   :  { %1908 = vsyncadd [#allocation5], 4294967040 }
 0x468   :  { %1575 = vsyncpa [#allocation3], 1 }
 0x469   :  { %1576 = vsyncpa [#allocation5], 1 }

</bundles_post_ra>
